<compile_context>
chip_gen: v5e
topology: v5e:2x2
jax: 0.10.0
libtpu: 0.0.40
codegen_flags: <defaults>
</compile_context>

<pallas_src>
import functools

import jax
import jax.numpy as jnp
from jax import lax
from jax.experimental import pallas as pl
from jax.experimental.pallas import tpu as pltpu


def _layer_norm(v, gamma, beta, eps=1e-5):
    mu = jnp.mean(v, axis=-1, keepdims=True)
    d = v - mu
    var = jnp.mean(d * d, axis=-1, keepdims=True)
    return d * lax.rsqrt(var + eps) * gamma + beta


def _sab_kernel(num_heads,
                x_ref,
                ln1_g, ln1_b,
                wqkv, bqkv,
                wo, bo,
                ln2_g, ln2_b,
                w1, b1, w2, b2,
                wfc, bfc,
                out_ref):
    Bt, S, E = x_ref.shape
    M = Bt * S                                     # matmul row count for this step
    H = num_heads
    Dh = E // H
    scale = float(Dh) ** -0.5

    # Fold the batch tile into the M dimension: (Bt, S, E) -> (Bt*S, E).
    # S == 8 is exactly one sublane tile, so this is layout-preserving.
    x = x_ref[...].reshape(M, E)

    def linear(a, w_ref, b_ref):
        # bf16 MXU operands (weights stored bf16), f32 accumulation; bias in f32.
        return (jnp.dot(a.astype(jnp.bfloat16), w_ref[...],
                        preferred_element_type=jnp.float32)
                + b_ref[...])

    # ---- LayerNorm1 + fused Q/K/V projection: ONE (M, E) @ (E, 3E) matmul ----
    xn = _layer_norm(x, ln1_g[...], ln1_b[...])
    qkv = linear(xn, wqkv, bqkv)                   # (M, 3E) f32
    q = qkv[:, :E]                                 # 128-aligned lane slices (free)
    k = qkv[:, E:2 * E]
    v = qkv[:, 2 * E:]

    # ---- scores for every (batch, head) pair; softmax as ONE stacked pass ----
    score_blocks = []
    for b in range(Bt):                            # static unroll; Bt, H are small
        qb = q[b * S:(b + 1) * S]                  # (S, E) f32, sublane-aligned
        kb = k[b * S:(b + 1) * S]
        for h in range(H):
            lo = h * Dh
            s = lax.dot_general(                   # (S, S) = qh @ kh^T, f32 acc
                qb[:, lo:lo + Dh].astype(jnp.bfloat16),
                kb[:, lo:lo + Dh].astype(jnp.bfloat16),
                (((1,), (1,)), ((), ())),
                preferred_element_type=jnp.float32)
            score_blocks.append(s)
    scores = jnp.concatenate(score_blocks, axis=0) * scale     # (Bt*H*S, S)
    scores = scores - jnp.max(scores, axis=-1, keepdims=True)
    p = jnp.exp(scores)
    p = p * pl.reciprocal(jnp.sum(p, axis=-1, keepdims=True), approx=True)

    # ---- P.V with the output projection folded into the head loop ----
    # acc_b += (p_bh @ v_bh) @ wo[h*Dh:(h+1)*Dh, :]  -> full 128-lane outputs,
    # no lane-axis concat of narrow head slices; bo added once at the end.
    wo_all = wo[...]                               # (E, E) bf16 resident
    attn_rows = []
    for b in range(Bt):
        vb = v[b * S:(b + 1) * S]                  # (S, E) f32
        acc = jnp.zeros((S, E), jnp.float32)
        for h in range(H):
            lo = h * Dh
            ph = p[(b * H + h) * S:(b * H + h + 1) * S].astype(jnp.bfloat16)
            pv = jnp.dot(ph, vb[:, lo:lo + Dh].astype(jnp.bfloat16),
                         preferred_element_type=jnp.float32)          # (S, Dh)
            acc = acc + jnp.dot(pv.astype(jnp.bfloat16),
                                wo_all[lo:lo + Dh, :],
                                preferred_element_type=jnp.float32)   # (S, E)
        attn_rows.append(acc)
    attn = jnp.concatenate(attn_rows, axis=0) + bo[...]               # (M, E)

    # ---- residual + LayerNorm2 + FFN + residual, all at M = Bt*S rows ----
    h1 = x + attn
    hn = _layer_norm(h1, ln2_g[...], ln2_b[...])
    ff = jnp.maximum(linear(hn, w1, b1), 0.0)      # ReLU in f32
    h2 = h1 + linear(ff, w2, b2)

    # ---- final projection (SAB.fc) ----
    out = linear(h2, wfc, bfc)                     # (M, d_out)
    out_ref[...] = out.reshape(Bt, S, out.shape[-1]).astype(out_ref.dtype)


def _pick_batch_block(B, S, target_rows=128):
    """Largest divisor of B whose flattened row count Bt*S stays <= target_rows.

    Targets M = 128 matmuls (exactly fills v5e's 128-wide MXU, half of v6e/v7x's
    256-wide MXU); for the tiny demo (B=2, S=8) this folds the whole batch into
    one grid step (M = 16) instead of two M = 8 steps.
    """
    best = 1
    for cand in range(1, B + 1):
        if B % cand == 0 and cand * S <= target_rows:
            best = cand
    return best


def sab_forward(x, params, num_heads):
    """x: (B, S, E) f32; returns (B, S, dim_out) f32."""
    B, S, E = x.shape
    d_out = params["wfc"].shape[1]
    Bt = _pick_batch_block(B, S)

    # Fuse Q/K/V into one (E, 3E) bf16 weight and one (1, 3E) f32 bias.
    wqkv = jnp.concatenate([params["wq"], params["wk"], params["wv"]], axis=1)
    bqkv = jnp.concatenate([params["bq"], params["bk"], params["bv"]], axis=1)

    flat = [
        params["ln1_g"], params["ln1_b"],
        wqkv, bqkv,
        params["wo"], params["bo"],
        params["ln2_g"], params["ln2_b"],
        params["w1"], params["b1"], params["w2"], params["b2"],
        params["wfc"], params["bfc"],
    ]

    kernel = functools.partial(_sab_kernel, num_heads)

    # X / out tiled over batch blocks (double-buffered by the Pallas pipeline);
    # all parameters are whole-array VMEM residents (constant block index ->
    # fetched once, no per-step DMA).
    in_specs = [pl.BlockSpec((Bt, S, E), lambda i: (i, 0, 0))]
    # TODO(synk): pipeline_mode=pl.Buffered(1) would single-buffer the resident
    # weights; left at the default since total residency is < 0.5 MiB here.
    in_specs += [pl.BlockSpec(p.shape, lambda i: (0, 0)) for p in flat]
    out_specs = pl.BlockSpec((Bt, S, d_out), lambda i: (i, 0, 0))

    # Advisory cost estimate: launch/scheduling-overhead bound at these sizes.
    flops = 2 * B * S * E * (6 * E + 2 * S + d_out)
    transcendentals = B * num_heads * S * S + 2 * B * S
    param_bytes = sum(int(p.size) * p.dtype.itemsize for p in flat)
    bytes_accessed = int(x.size) * 4 + B * S * d_out * 4 + param_bytes

    return pl.pallas_call(
        kernel,
        out_shape=jax.ShapeDtypeStruct((B, S, d_out), jnp.float32),
        grid=(B // Bt,),
        in_specs=in_specs,
        out_specs=out_specs,
        compiler_params=pltpu.CompilerParams(
            dimension_semantics=("parallel",),      # batch-block axis (cross-TC on v7x)
            vmem_limit_bytes=16 * 1024 * 1024,      # fits v5e's default scope; ample
        ),
        cost_estimate=pl.CostEstimate(
            flops=flops,
            transcendentals=transcendentals,
            bytes_accessed=bytes_accessed,
        ),
    )(x, *flat)


def init_sab_params(key, dim_in, dim_out, num_heads):
    """Weights stored as (in_features, out_features) (transpose of nn.Linear) in
    bf16 for the MXU; biases / LayerNorm params stay f32 (as (1, out) lane rows)."""
    E = dim_in
    assert E % num_heads == 0

    def linear_init(k, fan_in, fan_out):
        kw, kb = jax.random.split(k)
        bound = 1.0 / float(fan_in) ** 0.5
        w = jax.random.uniform(kw, (fan_in, fan_out), jnp.float32, -bound, bound)
        b = jax.random.uniform(kb, (fan_out,), jnp.float32, -bound, bound)
        return w.astype(jnp.bfloat16), b.reshape(1, -1)

    ks = jax.random.split(key, 7)
    wq, bq = linear_init(ks[0], E, E)
    wk, bk = linear_init(ks[1], E, E)
    wv, bv = linear_init(ks[2], E, E)
    wo, bo = linear_init(ks[3], E, E)
    w1, b1 = linear_init(ks[4], E, E)
    w2, b2 = linear_init(ks[5], E, E)
    wfc, bfc = linear_init(ks[6], E, dim_out)

    ones = jnp.ones((1, E), jnp.float32)
    zeros = jnp.zeros((1, E), jnp.float32)
    return dict(
        ln1_g=ones, ln1_b=zeros, ln2_g=ones, ln2_b=zeros,
        wq=wq, bq=bq, wk=wk, bk=bk, wv=wv, bv=bv, wo=wo, bo=bo,
        w1=w1, b1=b1, w2=w2, b2=b2, wfc=wfc, bfc=bfc,
    )


def sab_reference(x, params, num_heads):
    """Pure-JAX f32 reference matching the PyTorch SAB forward."""
    f32 = lambda a: a.astype(jnp.float32)
    B, S, E = x.shape
    Dh = E // num_heads

    def ln(v, g, b):
        mu = jnp.mean(v, -1, keepdims=True)
        var = jnp.mean((v - mu) ** 2, -1, keepdims=True)
        return (v - mu) / jnp.sqrt(var + 1e-5) * g + b

    xn = ln(x, f32(params["ln1_g"]), f32(params["ln1_b"]))
    q = xn @ f32(params["wq"]) + f32(params["bq"])
    k = xn @ f32(params["wk"]) + f32(params["bk"])
    v = xn @ f32(params["wv"]) + f32(params["bv"])

    qh = q.reshape(B, S, num_heads, Dh).transpose(0, 2, 1, 3)
    kh = k.reshape(B, S, num_heads, Dh).transpose(0, 2, 1, 3)
    vh = v.reshape(B, S, num_heads, Dh).transpose(0, 2, 1, 3)
    s = jnp.einsum("bhqd,bhkd->bhqk", qh, kh) / jnp.sqrt(jnp.float32(Dh))
    p = jax.nn.softmax(s, axis=-1)
    o = jnp.einsum("bhqk,bhkd->bhqd", p, vh)
    attn = (o.transpose(0, 2, 1, 3).reshape(B, S, E)
            @ f32(params["wo"]) + f32(params["bo"]))

    h = x + attn
    hn = ln(h, f32(params["ln2_g"]), f32(params["ln2_b"]))
    ff = jnp.maximum(hn @ f32(params["w1"]) + f32(params["b1"]), 0.0)
    h = h + ff @ f32(params["w2"]) + f32(params["b2"])
    return h @ f32(params["wfc"]) + f32(params["bfc"])


if __name__ == "__main__":
    # Small but lane-dense shapes: dim_in = dim_out = 128 (natural lane width),
    # seq = 8 sublanes, 4 heads (head_dim = 32). Both batch elements are folded
    # into a single grid step (M = 16 matmul rows).
    B, S, E, NUM_HEADS, D_OUT = 2, 8, 128, 4, 128

    key = jax.random.PRNGKey(0)
    key, kx, kp = jax.random.split(key, 3)
    x = jax.random.normal(kx, (B, S, E), jnp.float32)
    params = init_sab_params(kp, E, D_OUT, NUM_HEADS)

    out = sab_forward(x, params, NUM_HEADS)
    out = jax.block_until_ready(out)

    ref = sab_reference(x, params, NUM_HEADS)
    assert out.shape == (B, S, D_OUT), out.shape
    # bf16 MXU operands (f32 accumulation) + approx softmax reciprocal vs. a
    # pure-f32 reference.
    assert jnp.allclose(out, ref, atol=5e-2, rtol=5e-2), (
        "mismatch vs reference, max abs diff = %f"
        % float(jnp.max(jnp.abs(out - ref))))

    print("KERNEL_OK")
</pallas_src>

<mosaic_0001>
module attributes {stable_mosaic.version = 11 : i64} {
  func.func @_sab_kernel(%arg0: i32, %arg1: memref<2x8x128xf32, #tpu.memory_space<vmem>>, %arg2: memref<1x128xf32, #tpu.memory_space<vmem>>, %arg3: memref<1x128xf32, #tpu.memory_space<vmem>>, %arg4: memref<128x384xbf16, #tpu.memory_space<vmem>>, %arg5: memref<1x384xf32, #tpu.memory_space<vmem>>, %arg6: memref<128x128xbf16, #tpu.memory_space<vmem>>, %arg7: memref<1x128xf32, #tpu.memory_space<vmem>>, %arg8: memref<1x128xf32, #tpu.memory_space<vmem>>, %arg9: memref<1x128xf32, #tpu.memory_space<vmem>>, %arg10: memref<128x128xbf16, #tpu.memory_space<vmem>>, %arg11: memref<1x128xf32, #tpu.memory_space<vmem>>, %arg12: memref<128x128xbf16, #tpu.memory_space<vmem>>, %arg13: memref<1x128xf32, #tpu.memory_space<vmem>>, %arg14: memref<128x128xbf16, #tpu.memory_space<vmem>>, %arg15: memref<1x128xf32, #tpu.memory_space<vmem>>, %arg16: memref<2x8x128xf32, #tpu.memory_space<vmem>>) attributes {dimension_semantics = [#tpu.dimension_semantics<parallel>], iteration_bounds = array<i64: 1>, scalar_prefetch = 0 : i64, scratch_operands = 0 : i64, tpu.core_type = #tpu.core_type<tc>, window_params = [{transform_indices = @transform_0, window_bounds = array<i64: 2, 8, 128>}, {pipeline_mode = #tpu.pipeline_mode<synchronous>, transform_indices = @transform_1, window_bounds = array<i64: 1, 128>}, {pipeline_mode = #tpu.pipeline_mode<synchronous>, transform_indices = @transform_2, window_bounds = array<i64: 1, 128>}, {pipeline_mode = #tpu.pipeline_mode<synchronous>, transform_indices = @transform_3, window_bounds = array<i64: 128, 384>}, {pipeline_mode = #tpu.pipeline_mode<synchronous>, transform_indices = @transform_4, window_bounds = array<i64: 1, 384>}, {pipeline_mode = #tpu.pipeline_mode<synchronous>, transform_indices = @transform_5, window_bounds = array<i64: 128, 128>}, {pipeline_mode = #tpu.pipeline_mode<synchronous>, transform_indices = @transform_6, window_bounds = array<i64: 1, 128>}, {pipeline_mode = #tpu.pipeline_mode<synchronous>, transform_indices = @transform_7, window_bounds = array<i64: 1, 128>}, {pipeline_mode = #tpu.pipeline_mode<synchronous>, transform_indices = @transform_8, window_bounds = array<i64: 1, 128>}, {pipeline_mode = #tpu.pipeline_mode<synchronous>, transform_indices = @transform_9, window_bounds = array<i64: 128, 128>}, {pipeline_mode = #tpu.pipeline_mode<synchronous>, transform_indices = @transform_10, window_bounds = array<i64: 1, 128>}, {pipeline_mode = #tpu.pipeline_mode<synchronous>, transform_indices = @transform_11, window_bounds = array<i64: 128, 128>}, {pipeline_mode = #tpu.pipeline_mode<synchronous>, transform_indices = @transform_12, window_bounds = array<i64: 1, 128>}, {pipeline_mode = #tpu.pipeline_mode<synchronous>, transform_indices = @transform_13, window_bounds = array<i64: 128, 128>}, {pipeline_mode = #tpu.pipeline_mode<synchronous>, transform_indices = @transform_14, window_bounds = array<i64: 1, 128>}, {transform_indices = @transform_15, window_bounds = array<i64: 2, 8, 128>}]} {
    %c0 = arith.constant 0 : index
    %c0_0 = arith.constant 0 : index
    %c0_1 = arith.constant 0 : index
    %0 = vector.load %arg1[%c0, %c0_0, %c0_1] : memref<2x8x128xf32, #tpu.memory_space<vmem>>, vector<2x8x128xf32>
    %1 = vector.shape_cast %0 : vector<2x8x128xf32> to vector<16x128xf32>
    %c0_2 = arith.constant 0 : index
    %c0_3 = arith.constant 0 : index
    %2 = vector.load %arg2[%c0_2, %c0_3] : memref<1x128xf32, #tpu.memory_space<vmem>>, vector<1x128xf32>
    %c0_4 = arith.constant 0 : index
    %c0_5 = arith.constant 0 : index
    %3 = vector.load %arg3[%c0_4, %c0_5] : memref<1x128xf32, #tpu.memory_space<vmem>>, vector<1x128xf32>
    %cst = arith.constant dense<0.000000e+00> : vector<16xf32>
    %4 = vector.multi_reduction <add>, %1, %cst [1] : vector<16x128xf32> to vector<16xf32>
    %5 = vector.shape_cast %4 : vector<16xf32> to vector<16x1xf32>
    %cst_6 = arith.constant 1.280000e+02 : f32
    %6 = vector.broadcast %cst_6 : f32 to vector<16x1xf32>
    %7 = arith.divf %5, %6 : vector<16x1xf32>
    %8 = vector.broadcast %7 : vector<16x1xf32> to vector<16x128xf32>
    %9 = arith.subf %1, %8 : vector<16x128xf32>
    %10 = arith.mulf %9, %9 : vector<16x128xf32>
    %cst_7 = arith.constant dense<0.000000e+00> : vector<16xf32>
    %11 = vector.multi_reduction <add>, %10, %cst_7 [1] : vector<16x128xf32> to vector<16xf32>
    %12 = vector.shape_cast %11 : vector<16xf32> to vector<16x1xf32>
    %cst_8 = arith.constant 1.280000e+02 : f32
    %13 = vector.broadcast %cst_8 : f32 to vector<16x1xf32>
    %14 = arith.divf %12, %13 : vector<16x1xf32>
    %cst_9 = arith.constant 9.99999974E-6 : f32
    %15 = vector.broadcast %cst_9 : f32 to vector<16x1xf32>
    %16 = arith.addf %14, %15 : vector<16x1xf32>
    %17 = math.rsqrt %16 : vector<16x1xf32>
    %18 = vector.broadcast %17 : vector<16x1xf32> to vector<16x128xf32>
    %19 = arith.mulf %9, %18 : vector<16x128xf32>
    %20 = vector.broadcast %2 : vector<1x128xf32> to vector<16x128xf32>
    %21 = arith.mulf %19, %20 : vector<16x128xf32>
    %22 = vector.broadcast %3 : vector<1x128xf32> to vector<16x128xf32>
    %23 = arith.addf %21, %22 : vector<16x128xf32>
    %24 = arith.truncf %23 : vector<16x128xf32> to vector<16x128xbf16>
    %c0_10 = arith.constant 0 : index
    %c0_11 = arith.constant 0 : index
    %25 = vector.load %arg4[%c0_10, %c0_11] : memref<128x384xbf16, #tpu.memory_space<vmem>>, vector<128x384xbf16>
    %cst_12 = arith.constant dense<0.000000e+00> : vector<16x384xf32>
    %26 = tpu.matmul %24, %25, %cst_12 {dimension_numbers = #tpu.dot_dimension_numbers<[1], [0], [0], [1], [0, 0, 1, 1], [], []>} : vector<16x128xbf16>, vector<128x384xbf16>, vector<16x384xf32> -> vector<16x384xf32>
    %c0_13 = arith.constant 0 : index
    %c0_14 = arith.constant 0 : index
    %27 = vector.load %arg5[%c0_13, %c0_14] : memref<1x384xf32, #tpu.memory_space<vmem>>, vector<1x384xf32>
    %28 = vector.broadcast %27 : vector<1x384xf32> to vector<16x384xf32>
    %29 = arith.addf %26, %28 : vector<16x384xf32>
    %30 = vector.extract_strided_slice %29 {offsets = [0, 0], sizes = [16, 128], strides = [1, 1]} : vector<16x384xf32> to vector<16x128xf32>
    %31 = vector.extract_strided_slice %29 {offsets = [0, 128], sizes = [16, 128], strides = [1, 1]} : vector<16x384xf32> to vector<16x128xf32>
    %32 = vector.extract_strided_slice %29 {offsets = [0, 256], sizes = [16, 128], strides = [1, 1]} : vector<16x384xf32> to vector<16x128xf32>
    %33 = vector.extract_strided_slice %30 {offsets = [0, 0], sizes = [8, 128], strides = [1, 1]} : vector<16x128xf32> to vector<8x128xf32>
    %34 = vector.extract_strided_slice %31 {offsets = [0, 0], sizes = [8, 128], strides = [1, 1]} : vector<16x128xf32> to vector<8x128xf32>
    %35 = vector.extract_strided_slice %33 {offsets = [0, 0], sizes = [8, 32], strides = [1, 1]} : vector<8x128xf32> to vector<8x32xf32>
    %36 = arith.truncf %35 : vector<8x32xf32> to vector<8x32xbf16>
    %37 = vector.extract_strided_slice %34 {offsets = [0, 0], sizes = [8, 32], strides = [1, 1]} : vector<8x128xf32> to vector<8x32xf32>
    %38 = arith.truncf %37 : vector<8x32xf32> to vector<8x32xbf16>
    %cst_15 = arith.constant dense<0.000000e+00> : vector<8x8xf32>
    %39 = tpu.matmul %36, %38, %cst_15 {dimension_numbers = #tpu.dot_dimension_numbers<[1], [1], [0], [0], [0, 0, 1, 0], [], []>} : vector<8x32xbf16>, vector<8x32xbf16>, vector<8x8xf32> -> vector<8x8xf32>
    %40 = vector.extract_strided_slice %33 {offsets = [0, 32], sizes = [8, 32], strides = [1, 1]} : vector<8x128xf32> to vector<8x32xf32>
    %41 = arith.truncf %40 : vector<8x32xf32> to vector<8x32xbf16>
    %42 = vector.extract_strided_slice %34 {offsets = [0, 32], sizes = [8, 32], strides = [1, 1]} : vector<8x128xf32> to vector<8x32xf32>
    %43 = arith.truncf %42 : vector<8x32xf32> to vector<8x32xbf16>
    %cst_16 = arith.constant dense<0.000000e+00> : vector<8x8xf32>
    %44 = tpu.matmul %41, %43, %cst_16 {dimension_numbers = #tpu.dot_dimension_numbers<[1], [1], [0], [0], [0, 0, 1, 0], [], []>} : vector<8x32xbf16>, vector<8x32xbf16>, vector<8x8xf32> -> vector<8x8xf32>
    %45 = vector.extract_strided_slice %33 {offsets = [0, 64], sizes = [8, 32], strides = [1, 1]} : vector<8x128xf32> to vector<8x32xf32>
    %46 = arith.truncf %45 : vector<8x32xf32> to vector<8x32xbf16>
    %47 = vector.extract_strided_slice %34 {offsets = [0, 64], sizes = [8, 32], strides = [1, 1]} : vector<8x128xf32> to vector<8x32xf32>
    %48 = arith.truncf %47 : vector<8x32xf32> to vector<8x32xbf16>
    %cst_17 = arith.constant dense<0.000000e+00> : vector<8x8xf32>
    %49 = tpu.matmul %46, %48, %cst_17 {dimension_numbers = #tpu.dot_dimension_numbers<[1], [1], [0], [0], [0, 0, 1, 0], [], []>} : vector<8x32xbf16>, vector<8x32xbf16>, vector<8x8xf32> -> vector<8x8xf32>
    %50 = vector.extract_strided_slice %33 {offsets = [0, 96], sizes = [8, 32], strides = [1, 1]} : vector<8x128xf32> to vector<8x32xf32>
    %51 = arith.truncf %50 : vector<8x32xf32> to vector<8x32xbf16>
    %52 = vector.extract_strided_slice %34 {offsets = [0, 96], sizes = [8, 32], strides = [1, 1]} : vector<8x128xf32> to vector<8x32xf32>
    %53 = arith.truncf %52 : vector<8x32xf32> to vector<8x32xbf16>
    %cst_18 = arith.constant dense<0.000000e+00> : vector<8x8xf32>
    %54 = tpu.matmul %51, %53, %cst_18 {dimension_numbers = #tpu.dot_dimension_numbers<[1], [1], [0], [0], [0, 0, 1, 0], [], []>} : vector<8x32xbf16>, vector<8x32xbf16>, vector<8x8xf32> -> vector<8x8xf32>
    %55 = vector.extract_strided_slice %30 {offsets = [8, 0], sizes = [8, 128], strides = [1, 1]} : vector<16x128xf32> to vector<8x128xf32>
    %56 = vector.extract_strided_slice %31 {offsets = [8, 0], sizes = [8, 128], strides = [1, 1]} : vector<16x128xf32> to vector<8x128xf32>
    %57 = vector.extract_strided_slice %55 {offsets = [0, 0], sizes = [8, 32], strides = [1, 1]} : vector<8x128xf32> to vector<8x32xf32>
    %58 = arith.truncf %57 : vector<8x32xf32> to vector<8x32xbf16>
    %59 = vector.extract_strided_slice %56 {offsets = [0, 0], sizes = [8, 32], strides = [1, 1]} : vector<8x128xf32> to vector<8x32xf32>
    %60 = arith.truncf %59 : vector<8x32xf32> to vector<8x32xbf16>
    %cst_19 = arith.constant dense<0.000000e+00> : vector<8x8xf32>
    %61 = tpu.matmul %58, %60, %cst_19 {dimension_numbers = #tpu.dot_dimension_numbers<[1], [1], [0], [0], [0, 0, 1, 0], [], []>} : vector<8x32xbf16>, vector<8x32xbf16>, vector<8x8xf32> -> vector<8x8xf32>
    %62 = vector.extract_strided_slice %55 {offsets = [0, 32], sizes = [8, 32], strides = [1, 1]} : vector<8x128xf32> to vector<8x32xf32>
    %63 = arith.truncf %62 : vector<8x32xf32> to vector<8x32xbf16>
    %64 = vector.extract_strided_slice %56 {offsets = [0, 32], sizes = [8, 32], strides = [1, 1]} : vector<8x128xf32> to vector<8x32xf32>
    %65 = arith.truncf %64 : vector<8x32xf32> to vector<8x32xbf16>
    %cst_20 = arith.constant dense<0.000000e+00> : vector<8x8xf32>
    %66 = tpu.matmul %63, %65, %cst_20 {dimension_numbers = #tpu.dot_dimension_numbers<[1], [1], [0], [0], [0, 0, 1, 0], [], []>} : vector<8x32xbf16>, vector<8x32xbf16>, vector<8x8xf32> -> vector<8x8xf32>
    %67 = vector.extract_strided_slice %55 {offsets = [0, 64], sizes = [8, 32], strides = [1, 1]} : vector<8x128xf32> to vector<8x32xf32>
    %68 = arith.truncf %67 : vector<8x32xf32> to vector<8x32xbf16>
    %69 = vector.extract_strided_slice %56 {offsets = [0, 64], sizes = [8, 32], strides = [1, 1]} : vector<8x128xf32> to vector<8x32xf32>
    %70 = arith.truncf %69 : vector<8x32xf32> to vector<8x32xbf16>
    %cst_21 = arith.constant dense<0.000000e+00> : vector<8x8xf32>
    %71 = tpu.matmul %68, %70, %cst_21 {dimension_numbers = #tpu.dot_dimension_numbers<[1], [1], [0], [0], [0, 0, 1, 0], [], []>} : vector<8x32xbf16>, vector<8x32xbf16>, vector<8x8xf32> -> vector<8x8xf32>
    %72 = vector.extract_strided_slice %55 {offsets = [0, 96], sizes = [8, 32], strides = [1, 1]} : vector<8x128xf32> to vector<8x32xf32>
    %73 = arith.truncf %72 : vector<8x32xf32> to vector<8x32xbf16>
    %74 = vector.extract_strided_slice %56 {offsets = [0, 96], sizes = [8, 32], strides = [1, 1]} : vector<8x128xf32> to vector<8x32xf32>
    %75 = arith.truncf %74 : vector<8x32xf32> to vector<8x32xbf16>
    %cst_22 = arith.constant dense<0.000000e+00> : vector<8x8xf32>
    %76 = tpu.matmul %73, %75, %cst_22 {dimension_numbers = #tpu.dot_dimension_numbers<[1], [1], [0], [0], [0, 0, 1, 0], [], []>} : vector<8x32xbf16>, vector<8x32xbf16>, vector<8x8xf32> -> vector<8x8xf32>
    %77 = tpu.concatenate %39, %44, %49, %54, %61, %66, %71, %76 in 0 : vector<8x8xf32>, vector<8x8xf32>, vector<8x8xf32>, vector<8x8xf32>, vector<8x8xf32>, vector<8x8xf32>, vector<8x8xf32>, vector<8x8xf32> -> vector<64x8xf32>
    %cst_23 = arith.constant 0.176776692 : f32
    %78 = vector.broadcast %cst_23 : f32 to vector<64x8xf32>
    %79 = arith.mulf %77, %78 : vector<64x8xf32>
    %cst_24 = arith.constant dense<0xFF800000> : vector<64xf32>
    %80 = vector.multi_reduction <maximumf>, %79, %cst_24 [1] : vector<64x8xf32> to vector<64xf32>
    %81 = vector.shape_cast %80 : vector<64xf32> to vector<64x1xf32>
    %82 = vector.broadcast %81 : vector<64x1xf32> to vector<64x8xf32>
    %83 = arith.subf %79, %82 : vector<64x8xf32>
    %84 = math.exp %83 : vector<64x8xf32>
    %cst_25 = arith.constant dense<0.000000e+00> : vector<64xf32>
    %85 = vector.multi_reduction <add>, %84, %cst_25 [1] : vector<64x8xf32> to vector<64xf32>
    %86 = vector.shape_cast %85 : vector<64xf32> to vector<64x1xf32>
    %87 = tpu.reciprocal %86 {approx = true} : vector<64x1xf32> -> vector<64x1xf32>
    %88 = vector.broadcast %87 : vector<64x1xf32> to vector<64x8xf32>
    %89 = arith.mulf %84, %88 : vector<64x8xf32>
    %c0_26 = arith.constant 0 : index
    %c0_27 = arith.constant 0 : index
    %90 = vector.load %arg6[%c0_26, %c0_27] : memref<128x128xbf16, #tpu.memory_space<vmem>>, vector<128x128xbf16>
    %91 = vector.extract_strided_slice %32 {offsets = [0, 0], sizes = [8, 128], strides = [1, 1]} : vector<16x128xf32> to vector<8x128xf32>
    %cst_28 = arith.constant 0.000000e+00 : f32
    %92 = vector.broadcast %cst_28 : f32 to vector<8x128xf32>
    %93 = vector.extract_strided_slice %89 {offsets = [0, 0], sizes = [8, 8], strides = [1, 1]} : vector<64x8xf32> to vector<8x8xf32>
    %94 = arith.truncf %93 : vector<8x8xf32> to vector<8x8xbf16>
    %95 = vector.extract_strided_slice %91 {offsets = [0, 0], sizes = [8, 32], strides = [1, 1]} : vector<8x128xf32> to vector<8x32xf32>
    %96 = arith.truncf %95 : vector<8x32xf32> to vector<8x32xbf16>
    %cst_29 = arith.constant dense<0.000000e+00> : vector<8x32xf32>
    %97 = tpu.matmul %94, %96, %cst_29 {dimension_numbers = #tpu.dot_dimension_numbers<[1], [0], [0], [1], [0, 0, 1, 1], [], []>} : vector<8x8xbf16>, vector<8x32xbf16>, vector<8x32xf32> -> vector<8x32xf32>
    %98 = arith.truncf %97 : vector<8x32xf32> to vector<8x32xbf16>
    %99 = vector.extract_strided_slice %90 {offsets = [0, 0], sizes = [32, 128], strides = [1, 1]} : vector<128x128xbf16> to vector<32x128xbf16>
    %cst_30 = arith.constant dense<0.000000e+00> : vector<8x128xf32>
    %100 = tpu.matmul %98, %99, %cst_30 {dimension_numbers = #tpu.dot_dimension_numbers<[1], [0], [0], [1], [0, 0, 1, 1], [], []>} : vector<8x32xbf16>, vector<32x128xbf16>, vector<8x128xf32> -> vector<8x128xf32>
    %101 = arith.addf %92, %100 : vector<8x128xf32>
    %102 = vector.extract_strided_slice %89 {offsets = [8, 0], sizes = [8, 8], strides = [1, 1]} : vector<64x8xf32> to vector<8x8xf32>
    %103 = arith.truncf %102 : vector<8x8xf32> to vector<8x8xbf16>
    %104 = vector.extract_strided_slice %91 {offsets = [0, 32], sizes = [8, 32], strides = [1, 1]} : vector<8x128xf32> to vector<8x32xf32>
    %105 = arith.truncf %104 : vector<8x32xf32> to vector<8x32xbf16>
    %cst_31 = arith.constant dense<0.000000e+00> : vector<8x32xf32>
    %106 = tpu.matmul %103, %105, %cst_31 {dimension_numbers = #tpu.dot_dimension_numbers<[1], [0], [0], [1], [0, 0, 1, 1], [], []>} : vector<8x8xbf16>, vector<8x32xbf16>, vector<8x32xf32> -> vector<8x32xf32>
    %107 = arith.truncf %106 : vector<8x32xf32> to vector<8x32xbf16>
    %108 = vector.extract_strided_slice %90 {offsets = [32, 0], sizes = [32, 128], strides = [1, 1]} : vector<128x128xbf16> to vector<32x128xbf16>
    %cst_32 = arith.constant dense<0.000000e+00> : vector<8x128xf32>
    %109 = tpu.matmul %107, %108, %cst_32 {dimension_numbers = #tpu.dot_dimension_numbers<[1], [0], [0], [1], [0, 0, 1, 1], [], []>} : vector<8x32xbf16>, vector<32x128xbf16>, vector<8x128xf32> -> vector<8x128xf32>
    %110 = arith.addf %101, %109 : vector<8x128xf32>
    %111 = vector.extract_strided_slice %89 {offsets = [16, 0], sizes = [8, 8], strides = [1, 1]} : vector<64x8xf32> to vector<8x8xf32>
    %112 = arith.truncf %111 : vector<8x8xf32> to vector<8x8xbf16>
    %113 = vector.extract_strided_slice %91 {offsets = [0, 64], sizes = [8, 32], strides = [1, 1]} : vector<8x128xf32> to vector<8x32xf32>
    %114 = arith.truncf %113 : vector<8x32xf32> to vector<8x32xbf16>
    %cst_33 = arith.constant dense<0.000000e+00> : vector<8x32xf32>
    %115 = tpu.matmul %112, %114, %cst_33 {dimension_numbers = #tpu.dot_dimension_numbers<[1], [0], [0], [1], [0, 0, 1, 1], [], []>} : vector<8x8xbf16>, vector<8x32xbf16>, vector<8x32xf32> -> vector<8x32xf32>
    %116 = arith.truncf %115 : vector<8x32xf32> to vector<8x32xbf16>
    %117 = vector.extract_strided_slice %90 {offsets = [64, 0], sizes = [32, 128], strides = [1, 1]} : vector<128x128xbf16> to vector<32x128xbf16>
    %cst_34 = arith.constant dense<0.000000e+00> : vector<8x128xf32>
    %118 = tpu.matmul %116, %117, %cst_34 {dimension_numbers = #tpu.dot_dimension_numbers<[1], [0], [0], [1], [0, 0, 1, 1], [], []>} : vector<8x32xbf16>, vector<32x128xbf16>, vector<8x128xf32> -> vector<8x128xf32>
    %119 = arith.addf %110, %118 : vector<8x128xf32>
    %120 = vector.extract_strided_slice %89 {offsets = [24, 0], sizes = [8, 8], strides = [1, 1]} : vector<64x8xf32> to vector<8x8xf32>
    %121 = arith.truncf %120 : vector<8x8xf32> to vector<8x8xbf16>
    %122 = vector.extract_strided_slice %91 {offsets = [0, 96], sizes = [8, 32], strides = [1, 1]} : vector<8x128xf32> to vector<8x32xf32>
    %123 = arith.truncf %122 : vector<8x32xf32> to vector<8x32xbf16>
    %cst_35 = arith.constant dense<0.000000e+00> : vector<8x32xf32>
    %124 = tpu.matmul %121, %123, %cst_35 {dimension_numbers = #tpu.dot_dimension_numbers<[1], [0], [0], [1], [0, 0, 1, 1], [], []>} : vector<8x8xbf16>, vector<8x32xbf16>, vector<8x32xf32> -> vector<8x32xf32>
    %125 = arith.truncf %124 : vector<8x32xf32> to vector<8x32xbf16>
    %126 = vector.extract_strided_slice %90 {offsets = [96, 0], sizes = [32, 128], strides = [1, 1]} : vector<128x128xbf16> to vector<32x128xbf16>
    %cst_36 = arith.constant dense<0.000000e+00> : vector<8x128xf32>
    %127 = tpu.matmul %125, %126, %cst_36 {dimension_numbers = #tpu.dot_dimension_numbers<[1], [0], [0], [1], [0, 0, 1, 1], [], []>} : vector<8x32xbf16>, vector<32x128xbf16>, vector<8x128xf32> -> vector<8x128xf32>
    %128 = arith.addf %119, %127 : vector<8x128xf32>
    %129 = vector.extract_strided_slice %32 {offsets = [8, 0], sizes = [8, 128], strides = [1, 1]} : vector<16x128xf32> to vector<8x128xf32>
    %cst_37 = arith.constant 0.000000e+00 : f32
    %130 = vector.broadcast %cst_37 : f32 to vector<8x128xf32>
    %131 = vector.extract_strided_slice %89 {offsets = [32, 0], sizes = [8, 8], strides = [1, 1]} : vector<64x8xf32> to vector<8x8xf32>
    %132 = arith.truncf %131 : vector<8x8xf32> to vector<8x8xbf16>
    %133 = vector.extract_strided_slice %129 {offsets = [0, 0], sizes = [8, 32], strides = [1, 1]} : vector<8x128xf32> to vector<8x32xf32>
    %134 = arith.truncf %133 : vector<8x32xf32> to vector<8x32xbf16>
    %cst_38 = arith.constant dense<0.000000e+00> : vector<8x32xf32>
    %135 = tpu.matmul %132, %134, %cst_38 {dimension_numbers = #tpu.dot_dimension_numbers<[1], [0], [0], [1], [0, 0, 1, 1], [], []>} : vector<8x8xbf16>, vector<8x32xbf16>, vector<8x32xf32> -> vector<8x32xf32>
    %136 = arith.truncf %135 : vector<8x32xf32> to vector<8x32xbf16>
    %137 = vector.extract_strided_slice %90 {offsets = [0, 0], sizes = [32, 128], strides = [1, 1]} : vector<128x128xbf16> to vector<32x128xbf16>
    %cst_39 = arith.constant dense<0.000000e+00> : vector<8x128xf32>
    %138 = tpu.matmul %136, %137, %cst_39 {dimension_numbers = #tpu.dot_dimension_numbers<[1], [0], [0], [1], [0, 0, 1, 1], [], []>} : vector<8x32xbf16>, vector<32x128xbf16>, vector<8x128xf32> -> vector<8x128xf32>
    %139 = arith.addf %130, %138 : vector<8x128xf32>
    %140 = vector.extract_strided_slice %89 {offsets = [40, 0], sizes = [8, 8], strides = [1, 1]} : vector<64x8xf32> to vector<8x8xf32>
    %141 = arith.truncf %140 : vector<8x8xf32> to vector<8x8xbf16>
    %142 = vector.extract_strided_slice %129 {offsets = [0, 32], sizes = [8, 32], strides = [1, 1]} : vector<8x128xf32> to vector<8x32xf32>
    %143 = arith.truncf %142 : vector<8x32xf32> to vector<8x32xbf16>
    %cst_40 = arith.constant dense<0.000000e+00> : vector<8x32xf32>
    %144 = tpu.matmul %141, %143, %cst_40 {dimension_numbers = #tpu.dot_dimension_numbers<[1], [0], [0], [1], [0, 0, 1, 1], [], []>} : vector<8x8xbf16>, vector<8x32xbf16>, vector<8x32xf32> -> vector<8x32xf32>
    %145 = arith.truncf %144 : vector<8x32xf32> to vector<8x32xbf16>
    %146 = vector.extract_strided_slice %90 {offsets = [32, 0], sizes = [32, 128], strides = [1, 1]} : vector<128x128xbf16> to vector<32x128xbf16>
    %cst_41 = arith.constant dense<0.000000e+00> : vector<8x128xf32>
    %147 = tpu.matmul %145, %146, %cst_41 {dimension_numbers = #tpu.dot_dimension_numbers<[1], [0], [0], [1], [0, 0, 1, 1], [], []>} : vector<8x32xbf16>, vector<32x128xbf16>, vector<8x128xf32> -> vector<8x128xf32>
    %148 = arith.addf %139, %147 : vector<8x128xf32>
    %149 = vector.extract_strided_slice %89 {offsets = [48, 0], sizes = [8, 8], strides = [1, 1]} : vector<64x8xf32> to vector<8x8xf32>
    %150 = arith.truncf %149 : vector<8x8xf32> to vector<8x8xbf16>
    %151 = vector.extract_strided_slice %129 {offsets = [0, 64], sizes = [8, 32], strides = [1, 1]} : vector<8x128xf32> to vector<8x32xf32>
    %152 = arith.truncf %151 : vector<8x32xf32> to vector<8x32xbf16>
    %cst_42 = arith.constant dense<0.000000e+00> : vector<8x32xf32>
    %153 = tpu.matmul %150, %152, %cst_42 {dimension_numbers = #tpu.dot_dimension_numbers<[1], [0], [0], [1], [0, 0, 1, 1], [], []>} : vector<8x8xbf16>, vector<8x32xbf16>, vector<8x32xf32> -> vector<8x32xf32>
    %154 = arith.truncf %153 : vector<8x32xf32> to vector<8x32xbf16>
    %155 = vector.extract_strided_slice %90 {offsets = [64, 0], sizes = [32, 128], strides = [1, 1]} : vector<128x128xbf16> to vector<32x128xbf16>
    %cst_43 = arith.constant dense<0.000000e+00> : vector<8x128xf32>
    %156 = tpu.matmul %154, %155, %cst_43 {dimension_numbers = #tpu.dot_dimension_numbers<[1], [0], [0], [1], [0, 0, 1, 1], [], []>} : vector<8x32xbf16>, vector<32x128xbf16>, vector<8x128xf32> -> vector<8x128xf32>
    %157 = arith.addf %148, %156 : vector<8x128xf32>
    %158 = vector.extract_strided_slice %89 {offsets = [56, 0], sizes = [8, 8], strides = [1, 1]} : vector<64x8xf32> to vector<8x8xf32>
    %159 = arith.truncf %158 : vector<8x8xf32> to vector<8x8xbf16>
    %160 = vector.extract_strided_slice %129 {offsets = [0, 96], sizes = [8, 32], strides = [1, 1]} : vector<8x128xf32> to vector<8x32xf32>
    %161 = arith.truncf %160 : vector<8x32xf32> to vector<8x32xbf16>
    %cst_44 = arith.constant dense<0.000000e+00> : vector<8x32xf32>
    %162 = tpu.matmul %159, %161, %cst_44 {dimension_numbers = #tpu.dot_dimension_numbers<[1], [0], [0], [1], [0, 0, 1, 1], [], []>} : vector<8x8xbf16>, vector<8x32xbf16>, vector<8x32xf32> -> vector<8x32xf32>
    %163 = arith.truncf %162 : vector<8x32xf32> to vector<8x32xbf16>
    %164 = vector.extract_strided_slice %90 {offsets = [96, 0], sizes = [32, 128], strides = [1, 1]} : vector<128x128xbf16> to vector<32x128xbf16>
    %cst_45 = arith.constant dense<0.000000e+00> : vector<8x128xf32>
    %165 = tpu.matmul %163, %164, %cst_45 {dimension_numbers = #tpu.dot_dimension_numbers<[1], [0], [0], [1], [0, 0, 1, 1], [], []>} : vector<8x32xbf16>, vector<32x128xbf16>, vector<8x128xf32> -> vector<8x128xf32>
    %166 = arith.addf %157, %165 : vector<8x128xf32>
    %167 = tpu.concatenate %128, %166 in 0 : vector<8x128xf32>, vector<8x128xf32> -> vector<16x128xf32>
    %c0_46 = arith.constant 0 : index
    %c0_47 = arith.constant 0 : index
    %168 = vector.load %arg7[%c0_46, %c0_47] : memref<1x128xf32, #tpu.memory_space<vmem>>, vector<1x128xf32>
    %169 = vector.broadcast %168 : vector<1x128xf32> to vector<16x128xf32>
    %170 = arith.addf %167, %169 : vector<16x128xf32>
    %171 = arith.addf %1, %170 : vector<16x128xf32>
    %c0_48 = arith.constant 0 : index
    %c0_49 = arith.constant 0 : index
    %172 = vector.load %arg8[%c0_48, %c0_49] : memref<1x128xf32, #tpu.memory_space<vmem>>, vector<1x128xf32>
    %c0_50 = arith.constant 0 : index
    %c0_51 = arith.constant 0 : index
    %173 = vector.load %arg9[%c0_50, %c0_51] : memref<1x128xf32, #tpu.memory_space<vmem>>, vector<1x128xf32>
    %cst_52 = arith.constant dense<0.000000e+00> : vector<16xf32>
    %174 = vector.multi_reduction <add>, %171, %cst_52 [1] : vector<16x128xf32> to vector<16xf32>
    %175 = vector.shape_cast %174 : vector<16xf32> to vector<16x1xf32>
    %cst_53 = arith.constant 1.280000e+02 : f32
    %176 = vector.broadcast %cst_53 : f32 to vector<16x1xf32>
    %177 = arith.divf %175, %176 : vector<16x1xf32>
    %178 = vector.broadcast %177 : vector<16x1xf32> to vector<16x128xf32>
    %179 = arith.subf %171, %178 : vector<16x128xf32>
    %180 = arith.mulf %179, %179 : vector<16x128xf32>
    %cst_54 = arith.constant dense<0.000000e+00> : vector<16xf32>
    %181 = vector.multi_reduction <add>, %180, %cst_54 [1] : vector<16x128xf32> to vector<16xf32>
    %182 = vector.shape_cast %181 : vector<16xf32> to vector<16x1xf32>
    %cst_55 = arith.constant 1.280000e+02 : f32
    %183 = vector.broadcast %cst_55 : f32 to vector<16x1xf32>
    %184 = arith.divf %182, %183 : vector<16x1xf32>
    %cst_56 = arith.constant 9.99999974E-6 : f32
    %185 = vector.broadcast %cst_56 : f32 to vector<16x1xf32>
    %186 = arith.addf %184, %185 : vector<16x1xf32>
    %187 = math.rsqrt %186 : vector<16x1xf32>
    %188 = vector.broadcast %187 : vector<16x1xf32> to vector<16x128xf32>
    %189 = arith.mulf %179, %188 : vector<16x128xf32>
    %190 = vector.broadcast %172 : vector<1x128xf32> to vector<16x128xf32>
    %191 = arith.mulf %189, %190 : vector<16x128xf32>
    %192 = vector.broadcast %173 : vector<1x128xf32> to vector<16x128xf32>
    %193 = arith.addf %191, %192 : vector<16x128xf32>
    %194 = arith.truncf %193 : vector<16x128xf32> to vector<16x128xbf16>
    %c0_57 = arith.constant 0 : index
    %c0_58 = arith.constant 0 : index
    %195 = vector.load %arg10[%c0_57, %c0_58] : memref<128x128xbf16, #tpu.memory_space<vmem>>, vector<128x128xbf16>
    %cst_59 = arith.constant dense<0.000000e+00> : vector<16x128xf32>
    %196 = tpu.matmul %194, %195, %cst_59 {dimension_numbers = #tpu.dot_dimension_numbers<[1], [0], [0], [1], [0, 0, 1, 1], [], []>} : vector<16x128xbf16>, vector<128x128xbf16>, vector<16x128xf32> -> vector<16x128xf32>
    %c0_60 = arith.constant 0 : index
    %c0_61 = arith.constant 0 : index
    %197 = vector.load %arg11[%c0_60, %c0_61] : memref<1x128xf32, #tpu.memory_space<vmem>>, vector<1x128xf32>
    %198 = vector.broadcast %197 : vector<1x128xf32> to vector<16x128xf32>
    %199 = arith.addf %196, %198 : vector<16x128xf32>
    %cst_62 = arith.constant 0.000000e+00 : f32
    %200 = vector.broadcast %cst_62 : f32 to vector<16x128xf32>
    %201 = arith.maximumf %199, %200 : vector<16x128xf32>
    %202 = arith.truncf %201 : vector<16x128xf32> to vector<16x128xbf16>
    %c0_63 = arith.constant 0 : index
    %c0_64 = arith.constant 0 : index
    %203 = vector.load %arg12[%c0_63, %c0_64] : memref<128x128xbf16, #tpu.memory_space<vmem>>, vector<128x128xbf16>
    %cst_65 = arith.constant dense<0.000000e+00> : vector<16x128xf32>
    %204 = tpu.matmul %202, %203, %cst_65 {dimension_numbers = #tpu.dot_dimension_numbers<[1], [0], [0], [1], [0, 0, 1, 1], [], []>} : vector<16x128xbf16>, vector<128x128xbf16>, vector<16x128xf32> -> vector<16x128xf32>
    %c0_66 = arith.constant 0 : index
    %c0_67 = arith.constant 0 : index
    %205 = vector.load %arg13[%c0_66, %c0_67] : memref<1x128xf32, #tpu.memory_space<vmem>>, vector<1x128xf32>
    %206 = vector.broadcast %205 : vector<1x128xf32> to vector<16x128xf32>
    %207 = arith.addf %204, %206 : vector<16x128xf32>
    %208 = arith.addf %171, %207 : vector<16x128xf32>
    %209 = arith.truncf %208 : vector<16x128xf32> to vector<16x128xbf16>
    %c0_68 = arith.constant 0 : index
    %c0_69 = arith.constant 0 : index
    %210 = vector.load %arg14[%c0_68, %c0_69] : memref<128x128xbf16, #tpu.memory_space<vmem>>, vector<128x128xbf16>
    %cst_70 = arith.constant dense<0.000000e+00> : vector<16x128xf32>
    %211 = tpu.matmul %209, %210, %cst_70 {dimension_numbers = #tpu.dot_dimension_numbers<[1], [0], [0], [1], [0, 0, 1, 1], [], []>} : vector<16x128xbf16>, vector<128x128xbf16>, vector<16x128xf32> -> vector<16x128xf32>
    %c0_71 = arith.constant 0 : index
    %c0_72 = arith.constant 0 : index
    %212 = vector.load %arg15[%c0_71, %c0_72] : memref<1x128xf32, #tpu.memory_space<vmem>>, vector<1x128xf32>
    %213 = vector.broadcast %212 : vector<1x128xf32> to vector<16x128xf32>
    %214 = arith.addf %211, %213 : vector<16x128xf32>
    %215 = vector.shape_cast %214 : vector<16x128xf32> to vector<2x8x128xf32>
    %c0_73 = arith.constant 0 : index
    %c0_74 = arith.constant 0 : index
    %c0_75 = arith.constant 0 : index
    %216 = vector.load %arg16[%c0_73, %c0_74, %c0_75] : memref<2x8x128xf32, #tpu.memory_space<vmem>>, vector<2x8x128xf32>
    tpu.vector_store %arg16[%c0_73, %c0_74, %c0_75], %215 {strides = array<i32>} : memref<2x8x128xf32, #tpu.memory_space<vmem>>, vector<2x8x128xf32>,
    return
  }
  func.func @transform_0(%arg0: i32) -> (i32, i32, i32) {
    %c0_i32 = arith.constant 0 : i32
    %c0_i32_0 = arith.constant 0 : i32
    %c0_i32_1 = arith.constant 0 : i32
    return %arg0, %c0_i32, %c0_i32_0 : i32, i32, i32
  }
  func.func @transform_1(%arg0: i32) -> (i32, i32) {
    %c0_i32 = arith.constant 0 : i32
    %c0_i32_0 = arith.constant 0 : i32
    %c0_i32_1 = arith.constant 0 : i32
    return %c0_i32, %c0_i32_0 : i32, i32
  }
  func.func @transform_2(%arg0: i32) -> (i32, i32) {
    %c0_i32 = arith.constant 0 : i32
    %c0_i32_0 = arith.constant 0 : i32
    %c0_i32_1 = arith.constant 0 : i32
    return %c0_i32, %c0_i32_0 : i32, i32
  }
  func.func @transform_3(%arg0: i32) -> (i32, i32) {
    %c0_i32 = arith.constant 0 : i32
    %c0_i32_0 = arith.constant 0 : i32
    %c0_i32_1 = arith.constant 0 : i32
    return %c0_i32, %c0_i32_0 : i32, i32
  }
  func.func @transform_4(%arg0: i32) -> (i32, i32) {
    %c0_i32 = arith.constant 0 : i32
    %c0_i32_0 = arith.constant 0 : i32
    %c0_i32_1 = arith.constant 0 : i32
    return %c0_i32, %c0_i32_0 : i32, i32
  }
  func.func @transform_5(%arg0: i32) -> (i32, i32) {
    %c0_i32 = arith.constant 0 : i32
    %c0_i32_0 = arith.constant 0 : i32
    %c0_i32_1 = arith.constant 0 : i32
    return %c0_i32, %c0_i32_0 : i32, i32
  }
  func.func @transform_6(%arg0: i32) -> (i32, i32) {
    %c0_i32 = arith.constant 0 : i32
    %c0_i32_0 = arith.constant 0 : i32
    %c0_i32_1 = arith.constant 0 : i32
    return %c0_i32, %c0_i32_0 : i32, i32
  }
  func.func @transform_7(%arg0: i32) -> (i32, i32) {
    %c0_i32 = arith.constant 0 : i32
    %c0_i32_0 = arith.constant 0 : i32
    %c0_i32_1 = arith.constant 0 : i32
    return %c0_i32, %c0_i32_0 : i32, i32
  }
  func.func @transform_8(%arg0: i32) -> (i32, i32) {
    %c0_i32 = arith.constant 0 : i32
    %c0_i32_0 = arith.constant 0 : i32
    %c0_i32_1 = arith.constant 0 : i32
    return %c0_i32, %c0_i32_0 : i32, i32
  }
  func.func @transform_9(%arg0: i32) -> (i32, i32) {
    %c0_i32 = arith.constant 0 : i32
    %c0_i32_0 = arith.constant 0 : i32
    %c0_i32_1 = arith.constant 0 : i32
    return %c0_i32, %c0_i32_0 : i32, i32
  }
  func.func @transform_10(%arg0: i32) -> (i32, i32) {
    %c0_i32 = arith.constant 0 : i32
    %c0_i32_0 = arith.constant 0 : i32
    %c0_i32_1 = arith.constant 0 : i32
    return %c0_i32, %c0_i32_0 : i32, i32
  }
  func.func @transform_11(%arg0: i32) -> (i32, i32) {
    %c0_i32 = arith.constant 0 : i32
    %c0_i32_0 = arith.constant 0 : i32
    %c0_i32_1 = arith.constant 0 : i32
    return %c0_i32, %c0_i32_0 : i32, i32
  }
  func.func @transform_12(%arg0: i32) -> (i32, i32) {
    %c0_i32 = arith.constant 0 : i32
    %c0_i32_0 = arith.constant 0 : i32
    %c0_i32_1 = arith.constant 0 : i32
    return %c0_i32, %c0_i32_0 : i32, i32
  }
  func.func @transform_13(%arg0: i32) -> (i32, i32) {
    %c0_i32 = arith.constant 0 : i32
    %c0_i32_0 = arith.constant 0 : i32
    %c0_i32_1 = arith.constant 0 : i32
    return %c0_i32, %c0_i32_0 : i32, i32
  }
  func.func @transform_14(%arg0: i32) -> (i32, i32) {
    %c0_i32 = arith.constant 0 : i32
    %c0_i32_0 = arith.constant 0 : i32
    %c0_i32_1 = arith.constant 0 : i32
    return %c0_i32, %c0_i32_0 : i32, i32
  }
  func.func @transform_15(%arg0: i32) -> (i32, i32, i32) {
    %c0_i32 = arith.constant 0 : i32
    %c0_i32_0 = arith.constant 0 : i32
    %c0_i32_1 = arith.constant 0 : i32
    return %arg0, %c0_i32, %c0_i32_0 : i32, i32, i32
  }
}

</mosaic_0001>

<bundles_post_ra>
// kernel: tpu_custom_call.1
= control target key start
LH: loop header
LB: loop body
LE: loop exit
PB: predicated region body
PF: predicated region fallthrough
CT: control target
= control target key end

     0   :  { %20 = vsyncpa [#allocation3], 0  ;;  %s2375_s0 = inlined_call_operand.hbm [shape: f32[2,8,128], index: 0, kind: input, shape index: {}]   ;;  %s2376_s1 = inlined_call_operand.hbm [shape: f32[1,128], index: 1, kind: input, shape index: {}]   ;;  %s2377_s2 = inlined_call_operand.hbm [shape: f32[1,128], index: 2, kind: input, shape index: {}]   ;;  %s2378_s3 = inlined_call_operand.hbm [shape: bf16[128,384], index: 3, kind: input, shape index: {}]   ;;  %s2379_s4 = inlined_call_operand.vmem [shape: f32[1,384], index: 4, kind: input, shape index: {}]   ;;  %s2380_s5 = inlined_call_operand.hbm [shape: bf16[128,128], index: 5, kind: input, shape index: {}]   ;;  %s2381_s6 = inlined_call_operand.vmem [shape: f32[1,128], index: 6, kind: input, shape index: {}]   ;;  %s2382_s7 = inlined_call_operand.vmem [shape: f32[1,128], index: 7, kind: input, shape index: {}]   ;;  %s2383_s8 = inlined_call_operand.vmem [shape: f32[1,128], index: 8, kind: input, shape index: {}]   ;;  %s2384_s9 = inlined_call_operand.hbm [shape: bf16[128,128], index: 9, kind: input, shape index: {}]   ;;  %s2385_s10 = inlined_call_operand.vmem [shape: f32[1,128], index: 10, kind: input, shape index: {}]   ;;  %s2386_s11 = inlined_call_operand.hbm [shape: bf16[128,128], index: 11, kind: input, shape index: {}]   ;;  %s2387_s12 = inlined_call_operand.vmem [shape: f32[1,128], index: 12, kind: input, shape index: {}]   ;;  %s2388_s13 = inlined_call_operand.hbm [shape: bf16[128,128], index: 13, kind: input, shape index: {}]   ;;  %s2389_s14 = inlined_call_operand.vmem [shape: f32[1,128], index: 14, kind: input, shape index: {}]   ;;  %s2390_s15 = inlined_call_operand.hbm [shape: f32[2,8,128], index: 15, kind: output, shape index: {}]  }
   0x1   :  { %21 = vsyncpa [#allocation6], 0 }
   0x2   :  { %22 = vsyncpa [#allocation9], 0 }
   0x3   :  { %23 = vsyncpa [#allocation12], 0 }
   0x4   :  { %24 = vsyncpa [#allocation15], 0  ;;  %s44_s20 = sshll.u32 %s2376_s1, 4  ;;  %s45_s20 = int_to_ptr.hbm [resolvable:$true] %s44_s20 }
   0x5   :  { %25 = vsyncpa [#allocation4], 0  ;;  %s2046_s21 = smov [#allocation5]   ;;  %s65_s25 = sshll.u32 %s2378_s3, 4  ;;  %s66_s25 = int_to_ptr.hbm [resolvable:$true] %s65_s25 }
   0x6   :  { %s46_s22 = sshll.u32 %s2046_s21, 4  ;;  %s2047_s26 = smov [#allocation8]   ;;  %s47_s22 = int_to_ptr.vmem [resolvable:$true] %s46_s22 }
   0x7   :  { %49 = dma.hbm_to_vmem [thread:$0]  %s45_s20, 16, %s47_s22, [#allocation6]  }
   0x8   :  { %s67_s27 = sshll.u32 %s2047_s26, 4  ;;  %s2048_s28 = smov 192   ;;  %s68_s27 = int_to_ptr.vmem [resolvable:$true] %s67_s27 }
   0x9   :  { %s2049_s29 = smov 12   ;;  %s99_s1 = sshll.u32 %s2384_s9, 4  ;;  %s100_s1 = int_to_ptr.hbm [resolvable:$true] %s99_s1 }
   0xa   :  { %73 = dma.hbm_to_vmem [thread:$0]  %s66_s25, 3072, %s68_s27, [#allocation9], %s2048_s28, %s2048_s28, %s2049_s29  }
   0xb   :  { %s2050_s17 = smov [#allocation11]   ;;  %s30_s3 = sshll.u32 %s2375_s0, 4  ;;  %s31_s3 = int_to_ptr.hbm [resolvable:$true] %s30_s3 }
   0xc   :  { %s101_s18 = sshll.u32 %s2050_s17, 4  ;;  %s2051_s20 = smov 64   ;;  %s102_s18 = int_to_ptr.vmem [resolvable:$true] %s101_s18 }
   0xd   :  { %s2052_s22 = smov 4   ;;  %s2053_s23 = smov [#allocation2]  }
   0xe   :  { %107 = dma.hbm_to_vmem [thread:$0]  %s100_s1, 1024, %s102_s18, [#allocation12], %s2051_s20, %s2051_s20, %s2052_s22  }
   0xf   :  { %s32_s24 = sshll.u32 %s2053_s23, 4  ;;  %s2054_s25 = smov 128   ;;  %s33_s24 = int_to_ptr.vmem [resolvable:$true] %s32_s24 }
  0x10   :  { %s2055_s9 = smov 8   ;;  %s55_s0 = sshll.u32 %s2377_s2, 4  ;;  %s56_s0 = int_to_ptr.hbm [resolvable:$true] %s55_s0 }
  0x11   :  { %38 = dma.hbm_to_vmem [thread:$0]  %s31_s3, 256, %s33_s24, [#allocation3], %s2054_s25, %s2054_s25, %s2055_s9  }
  0x12   :  { %s2056_s28 = smov [#allocation7]   ;;  %s80_s1 = sshll.u32 %s2380_s5, 4  ;;  %s81_s1 = int_to_ptr.hbm [resolvable:$true] %s80_s1 }
  0x13   :  { %s57_s29 = sshll.u32 %s2056_s28, 4  ;;  %s2057_s17 = smov [#allocation10]   ;;  %s58_s29 = int_to_ptr.vmem [resolvable:$true] %s57_s29 }
  0x14   :  { %60 = dma.hbm_to_vmem [thread:$0]  %s56_s0, 16, %s58_s29, [#allocation6]  }
  0x15   :  { %s82_s18 = sshll.u32 %s2057_s17, 4  ;;  %s114_s3 = sshll.u32 %s2386_s11, 4  ;;  %s83_s18 = int_to_ptr.vmem [resolvable:$true] %s82_s18  ;;  %s115_s3 = int_to_ptr.hbm [resolvable:$true] %s114_s3 }
  0x16   :  { %88 = dma.hbm_to_vmem [thread:$0]  %s81_s1, 1024, %s83_s18, [#allocation9], %s2051_s20, %s2051_s20, %s2052_s22  }
  0x17   :  { %s129_s24 = sshll.u32 %s2388_s13, 4  ;;  %s2058_s26 = smov [#allocation13]   ;;  %s130_s24 = int_to_ptr.hbm [resolvable:$true] %s129_s24 }
  0x18   :  { %s116_s5 = sshll.u32 %s2058_s26, 4  ;;  %s2059_s27 = smov [#allocation14]   ;;  %s117_s5 = int_to_ptr.vmem [resolvable:$true] %s116_s5 }
  0x19   :  { %122 = dma.hbm_to_vmem [thread:$0]  %s115_s3, 1024, %s117_s5, [#allocation12], %s2051_s20, %s2051_s20, %s2052_s22  }
  0x1a   :  { %s131_s11 = sshll.u32 %s2059_s27, 4  ;;  %s132_s11 = int_to_ptr.vmem [resolvable:$true] %s131_s11 }
  0x1b   :  { %137 = dma.hbm_to_vmem [thread:$0]  %s130_s24, 1024, %s132_s11, [#allocation15], %s2051_s20, %s2051_s20, %s2052_s22  }
  0x1c   :  { %2034 = dma.done.wait [#allocation3], 256  }
  0x1d   :  { %2035 = vsyncadd [#allocation3], 4294967040 }
  0x1e   :  { %2036 = dma.done.wait [#allocation6], 32  }
  0x1f   :  { %2037 = vsyncadd [#allocation6], 4294967264 }
  0x20   :  { %2038 = dma.done.wait [#allocation9], 4096  }
  0x21   :  { %2039 = vsyncadd [#allocation9], 4294963200 }
  0x22   :  { %2040 = dma.done.wait [#allocation12], 2048  }
  0x23   :  { %2041 = vsyncadd [#allocation12], 4294965248 }
  0x24   :  { %2042 = dma.done.wait [#allocation15], 1024  }
  0x25   :  { %2043 = vsyncadd [#allocation15], 4294966272  ;;  %v2183_v0 = vld [vmem:[#allocation2] sm:$0xff]  ;;  %v2186_v1 = vld [vmem:[#allocation2 + $0x8] sm:$0xff]  ;;  %v2060_v2 = vmov 128.0   ;;  %vm447_vm7 = vcmask 261120  }
  0x26   :  { %177 = vadd.xlane.f32.xlu0 %v2183_v0  ;;  %1776 = vrcp.f32 %v2060_v2  ;;  %v1532_v17 = vld [vmem:[#allocation8 + $0xa8] sm:$0xf]  ;;  %v1716_v18 = vld [vmem:[#allocation8 + $0xb0] sm:$0xf0]  ;;  %v1715_v19 = vld [vmem:[#allocation8 + $0xac] sm:$0xf] }
  0x27   :  { %v1533_v20 = vor.u32 %v1716_v18, %v1532_v17  ;;  %v1534_v21 = vld [vmem:[#allocation8 + $0xb4] sm:$0xf0]  ;;  %v1540_v22 = vld [vmem:[#allocation8 + $0xb0] sm:$0xf]  ;;  %v1717_v23 = vld [vmem:[#allocation8 + $0xb8] sm:$0xf0] }
  0x28   :  { %v1537_v24 = vor.u32 %v1715_v19, %v1534_v21  ;;  %v1541_v25 = vor.u32 %v1717_v23, %v1540_v22  ;;  %v1520_v26 = vld [vmem:[#allocation8 + $0x90] sm:$0xf]  ;;  %v1713_v27 = vld [vmem:[#allocation8 + $0x98] sm:$0xf0]  ;;  %v1712_v28 = vld [vmem:[#allocation8 + $0x94] sm:$0xf] }
  0x29   :  { %403 = vmatpush.bf16.msra.mxu0 %v1533_v20  ;;  %v1521_v29 = vor.u32 %v1713_v27, %v1520_v26  ;;  %v1522_v30 = vld [vmem:[#allocation8 + $0x9c] sm:$0xf0]  ;;  %v1528_v31 = vld [vmem:[#allocation8 + $0x98] sm:$0xf]  ;;  %v1714_v32 = vld [vmem:[#allocation8 + $0xa0] sm:$0xf0] }
  0x2a   :  { %417 = vmatpush.bf16.msra.mxu1 %v1537_v24  ;;  %431 = vmatpush.bf16.msra.mxu2 %v1541_v25  ;;  %v1525_v33 = vor.u32 %v1712_v28, %v1522_v30  ;;  %v1529_v34 = vor.u32 %v1714_v32, %v1528_v31  ;;  %v1508_v35 = vld [vmem:[#allocation8 + $0x78] sm:$0xf]  ;;  %v1710_v36 = vld [vmem:[#allocation8 + $0x80] sm:$0xf0]  ;;  %v1709_v37 = vld [vmem:[#allocation8 + $0x7c] sm:$0xf] }
  0x2b   :  { %v1509_v38 = vor.u32 %v1710_v36, %v1508_v35  ;;  %v1510_v39 = vld [vmem:[#allocation8 + $0x84] sm:$0xf0]  ;;  %v1516_v40 = vld [vmem:[#allocation8 + $0x80] sm:$0xf]  ;;  %v1711_v41 = vld [vmem:[#allocation8 + $0x88] sm:$0xf0] }
  0x2c   :  { %v1777_v3 = vpop.eup %1776  ;;  %v1513_v42 = vor.u32 %v1709_v37, %v1510_v39  ;;  %v1517_v43 = vor.u32 %v1711_v41, %v1516_v40  ;;  %v1496_v44 = vld [vmem:[#allocation8 + $0x60] sm:$0xf]  ;;  %v1707_v45 = vld [vmem:[#allocation8 + $0x68] sm:$0xf0]  ;;  %v1706_v46 = vld [vmem:[#allocation8 + $0x64] sm:$0xf] }
  0x2d   :  { %v182_v4 = vmul.f32 128.0, %v1777_v3  ;;  %vm186_vm0 = vweird.f32 %v1777_v3  ;;  %404 = vmatpush.bf16.msra.mxu0 %v1521_v29  ;;  %v1497_v47 = vor.u32 %v1707_v45, %v1496_v44  ;;  %v1498_v48 = vld [vmem:[#allocation8 + $0x6c] sm:$0xf0]  ;;  %v1504_v49 = vld [vmem:[#allocation8 + $0x68] sm:$0xf]  ;;  %vm748_vm8 = vcmask 1043456  }
  0x2e   :  { %179 = vadd.xlane.f32.xlu0 %v2186_v1  ;;  %418 = vmatpush.bf16.msra.mxu1 %v1525_v33  ;;  %v1708_v50 = vld [vmem:[#allocation8 + $0x70] sm:$0xf0]  ;;  %v1501_v51 = vor.u32 %v1706_v46, %v1498_v48  ;;  %v1484_v53 = vld [vmem:[#allocation8 + $0x48] sm:$0xf]  ;;  %v1703_v55 = vld [vmem:[#allocation8 + $0x4c] sm:$0xf] }
  0x2f   :  { %v183_v5 = vsub.f32 1.0, %v182_v4  ;;  %432 = vmatpush.bf16.msra.mxu2 %v1529_v34  ;;  %v1505_v52 = vor.u32 %v1708_v50, %v1504_v49  ;;  %v1704_v54 = vld [vmem:[#allocation8 + $0x50] sm:$0xf0]  ;;  %v1486_v57 = vld [vmem:[#allocation8 + $0x54] sm:$0xf0]  ;;  %vm638_vm9 = vcmask 64512  }
  0x30   :  { %v1485_v56 = vor.u32 %v1704_v54, %v1484_v53  ;;  %v1492_v58 = vld [vmem:[#allocation8 + $0x50] sm:$0xf]  ;;  %v1705_v59 = vld [vmem:[#allocation8 + $0x58] sm:$0xf0]  ;;  %v1489_v60 = vor.u32 %v1703_v55, %v1486_v57  ;;  %v1700_v2 = vld [vmem:[#allocation8 + $0x34] sm:$0xf] }
  0x31   :  { %v184_v6 = vmul.f32 %v1777_v3, %v183_v5  ;;  %405 = vmatpush.bf16.msra.mxu0 %v1509_v38  ;;  %v1493_v61 = vor.u32 %v1705_v59, %v1492_v58  ;;  %v1472_v62 = vld [vmem:[#allocation8 + $0x30] sm:$0xf]  ;;  %v1701_v63 = vld [vmem:[#allocation8 + $0x38] sm:$0xf0]  ;;  %v1474_v4 = vld [vmem:[#allocation8 + $0x3c] sm:$0xf0] }
  0x32   :  { %419 = vmatpush.bf16.msra.mxu1 %v1513_v42  ;;  %v1480_v5 = vld [vmem:[#allocation8 + $0x38] sm:$0xf]  ;;  %v1468_v17 = vld [vmem:[#allocation8 + $0x20] sm:$0xf]  ;;  %v1699_v18 = vld [vmem:[#allocation8 + $0x28] sm:$0xf0] }
  0x33   :  { %v185_v7 = vadd.f32 %v1777_v3, %v184_v6  ;;  %433 = vmatpush.bf16.msra.mxu2 %v1517_v43  ;;  %v1702_v6 = vld [vmem:[#allocation8 + $0x40] sm:$0xf0]  ;;  %v1469_v20 = vor.u32 %v1699_v18, %v1468_v17  ;;  %v1448_v21 = vld [vmem:[#allocation8] sm:$0xf]  ;;  %v1695_v22 = vld [vmem:[#allocation8 + $0x8] sm:$0xf0] }
  0x34   :  { %v1694_v23 = vld [vmem:[#allocation8 + $0x4] sm:$0xf]  ;;  %v1449_v25 = vor.u32 %v1695_v22, %v1448_v21  ;;  %v1450_v26 = vld [vmem:[#allocation8 + $0xc] sm:$0xf0]  ;;  %v1456_v27 = vld [vmem:[#allocation8 + $0x8] sm:$0xf] }
  0x35   :  { %v2189_v8 = vsel %vm186_vm0, %v1777_v3, %v185_v7  ;;  %406 = vmatpush.bf16.msra.mxu0 %v1497_v47  ;;  %v1473_v3 = vor.u32 %v1701_v63, %v1472_v62  ;;  %v1477_v7 = vor.u32 %v1700_v2, %v1474_v4  ;;  %v1696_v28 = vld [vmem:[#allocation8 + $0x10] sm:$0xf0]  ;;  %v1453_v30 = vor.u32 %v1694_v23, %v1450_v26  ;;  %v1768_v49 = vld [vmem:[#allocation5] ss:$0 sm:$0xff]  ;;  %v1769_v54 = vld [vmem:[#allocation7] ss:$0 sm:$0xff] }
  0x36   :  { %420 = vmatpush.bf16.msra.mxu1 %v1501_v51  ;;  %v1457_v31 = vor.u32 %v1696_v28, %v1456_v27  ;;  %s2062_s0 = smov 32   ;;  %s2063_s19 = smov [#allocation16]  }
  0x37   :  { %434 = vmatpush.bf16.msra.mxu2 %v1505_v52  ;;  %s1427_s21 = sshll.u32 %s2063_s19, 4  ;;  %s1429_s2 = sshll.u32 %s2390_s15, 4  ;;  %s1428_s21 = int_to_ptr.vmem [resolvable:$true] %s1427_s21  ;;  %s1430_s2 = int_to_ptr.hbm [resolvable:$true] %s1429_s2 }
  0x39   :  { %407 = vmatpush.bf16.msra.mxu0 %v1485_v56 }
  0x3a   :  { %421 = vmatpush.bf16.msra.mxu1 %v1489_v60 }
  0x3b   :  { %435 = vmatpush.bf16.msra.mxu2 %v1493_v61 }
  0x3d   :  { %408 = vmatpush.bf16.msra.mxu0 %v1473_v3 }
  0x3e   :  { %422 = vmatpush.bf16.msra.mxu1 %v1477_v7 }
  0x99   :  { %v178_v9 = vpop.xlane.xlu0 %177 }
  0x9a   :  { %v188_v10 = vmul.f32 %v2189_v8, %v178_v9  ;;  %v1481_v9 = vor.u32 %v1702_v6, %v1480_v5 }
  0x9c   :  { %v2193_v11 = vsub.f32 %v2183_v0, %v188_v10  ;;  %436 = vmatpush.bf16.msra.mxu2 %v1481_v9  ;;  %v1460_v10 = vld [vmem:[#allocation8 + $0x18] sm:$0xf] }
  0x9e   :  { %v192_v12 = vmul.f32 %v2193_v11, %v2193_v11 }
  0xa0   :  { %194 = vadd.xlane.f32.xlu1 %v192_v12  ;;  %v1698_v12 = vld [vmem:[#allocation8 + $0x20] sm:$0xf0]  ;;  %437 = vmatpush.bf16.msra.mxu2 %v1469_v20 }
  0xa1   :  { %v180_v13 = vpop.xlane.xlu0 %179 }
  0xa2   :  { %v189_v14 = vmul.f32 %v2189_v8, %v180_v13  ;;  %v1697_v13 = vld [vmem:[#allocation8 + $0x1c] sm:$0xf] }
  0xa4   :  { %v2199_v15 = vsub.f32 %v2186_v1, %v189_v14  ;;  %v1461_v14 = vor.u32 %v1698_v12, %v1460_v10  ;;  %438 = vmatpush.bf16.msra.mxu2 %v1457_v31 }
  0xa6   :  { %v193_v16 = vmul.f32 %v2199_v15, %v2199_v15  ;;  %409 = vmatpush.bf16.msra.mxu0 %v1461_v14 }
  0xa8   :  { %196 = vadd.xlane.f32.xlu1 %v193_v16  ;;  %v1462_v16 = vld [vmem:[#allocation8 + $0x24] sm:$0xf0] }
  0xa9   :  { %v1465_v19 = vor.u32 %v1697_v13, %v1462_v16 }
  0xaa   :  { %410 = vmatpush.bf16.msra.mxu0 %v1449_v25 }
  0xab   :  { %423 = vmatpush.bf16.msra.mxu1 %v1465_v19 }
  0xaf   :  { %424 = vmatpush.bf16.msra.mxu1 %v1453_v30 }
 0x113   :  { %v195_v24 = vpop.xlane.xlu1 %194 }
 0x114   :  { %v198_v29 = vmul.f32 %v195_v24, %v2189_v8 }
 0x116   :  { %v200_v32 = vadd.f32 1e-05, %v198_v29 }
 0x118   :  { %1778 = vrsqrt.f32 %v200_v32  ;;  %vm208_vm2 = vweird.f32 %v200_v32 }
 0x11b   :  { %v197_v33 = vpop.xlane.xlu1 %196 }
 0x11c   :  { %v199_v34 = vmul.f32 %v197_v33, %v2189_v8 }
 0x11e   :  { %v1779_v35 = vpop.eup %1778  ;;  %v201_v36 = vadd.f32 1e-05, %v199_v34 }
 0x11f   :  { %v203_v37 = vmul.f32 %v1779_v35, %v200_v32  ;;  %vm209_vm1 = vweird.f32 %v1779_v35 }
 0x120   :  { %1780 = vrsqrt.f32 %v201_v36  ;;  %vm210_vm3 = vmor %vm208_vm2, %vm209_vm1  ;;  %vm218_vm5 = vweird.f32 %v201_v36 }
 0x121   :  { %v204_v38 = vmul.f32 %v1779_v35, %v203_v37 }
 0x123   :  { %v205_v39 = vmul.f32 0.5, %v204_v38 }
 0x125   :  { %v206_v40 = vsub.f32 1.5, %v205_v39 }
 0x126   :  { %v1781_v41 = vpop.eup %1780 }
 0x127   :  { %v207_v42 = vmul.f32 %v1779_v35, %v206_v40  ;;  %v213_v43 = vmul.f32 %v1781_v41, %v201_v36  ;;  %vm219_vm4 = vweird.f32 %v1781_v41 }
 0x128   :  { %vm220_vm6 = vmor %vm218_vm5, %vm219_vm4 }
 0x129   :  { %v214_v44 = vmul.f32 %v1781_v41, %v213_v43  ;;  %v211_v45 = vsel %vm210_vm3, %v1779_v35, %v207_v42 }
 0x12a   :  { %v222_v48 = vmul.f32 %v211_v45, %v2193_v11  ;;  %v2210_v11 = vld [vmem:[%s2379_s4] sm:$0x7]  ;;  %s2061_s4 = smov 96  }
 0x12b   :  { %v215_v46 = vmul.f32 0.5, %v214_v44  ;;  %v269_v59 = vperm.slane %v2210_v11, 0  ;;  %v270_v60 = vperm.slane %v2210_v11, 1  ;;  %v271_v4 = vperm.slane %v2210_v11, 2 }
 0x12c   :  { %v227_v53 = vmul.f32 %v1768_v49, %v222_v48 }
 0x12d   :  { %v216_v47 = vsub.f32 1.5, %v215_v46 }
 0x12e   :  { %v232_v56 = vadd.f32 %v1769_v54, %v227_v53 }
 0x12f   :  { %v217_v50 = vmul.f32 %v1781_v41, %v216_v47 }
 0x131   :  { %v221_v51 = vsel %vm220_vm6, %v1781_v41, %v217_v50 }
 0x132   :  { %v223_v52 = vmul.f32 %v221_v51, %v2199_v15 }
 0x134   :  { %v228_v55 = vmul.f32 %v1768_v49, %v223_v52 }
 0x136   :  { %v233_v57 = vadd.f32 %v1769_v54, %v228_v55 }
 0x138   :  { %v234_v58 = vpack.c.bf16 %v233_v57, %v232_v56 }
 0x13a   :  { %411 = vmatmul.bf16.vlgmr.msra.gmra.mxu0 %v234_v58  ;;  %425 = vmatmul.bf16.vlgmr.msra.gmra.mxu1 %v234_v58 }
 0x13b   :  { %439 = vmatmul.bf16.vlgmr.msra.gmra.mxu2 %v234_v58 }
 0x1b7   :  { %v412_v61 = vpop.f32.mrf.mxu0  ;;  %v426_v15 = vpop.f32.mrf.mxu1 }
 0x1b8   :  { %v413_v62 = vadd.f32 %v412_v61, %v269_v59  ;;  %v427_v63 = vadd.f32 %v426_v15, %v270_v60 }
 0x1ba   :  { %v2214_v2 = vpack.c.bf16 %v413_v62, %v413_v62  ;;  %v2216_v3 = vpack.c.bf16 %v427_v63, %v427_v63 }
 0x1bc   :  { %494 = vrot.lane.b32.xlu0 %v2216_v3, %s2051_s20  ;;  %471 = vrot.lane.b32.xlu2 %v2216_v3, %s2061_s4  ;;  %v452_v5 = vsel %vm447_vm7, %v2216_v3, 0 }
 0x1bd   :  { %492 = vrot.lane.b32.xlu1 %v2214_v2, %s2051_s20  ;;  %461 = vmatpush.bf16.xpose.msrb.mxu0 %v452_v5 }
 0x1be   :  { %v440_v6 = vpop.f32.mrf.mxu2 }
 0x1bf   :  { %v441_v7 = vadd.f32 %v440_v6, %v271_v4  ;;  %v428_v9 = vpop.f32.mrf.mxu1  ;;  %v414_v14 = vpop.f32.mrf.mxu0 }
 0x1c0   :  { %v429_v10 = vadd.f32 %v428_v9, %v270_v60  ;;  %v415_v18 = vadd.f32 %v414_v14, %v269_v59 }
 0x1c1   :  { %v2229_v12 = vpack.c.bf16 %v441_v7, %v441_v7 }
 0x1c2   :  { %v539_v13 = vpack.c.bf16 %v429_v10, %v429_v10  ;;  %v538_v19 = vpack.c.bf16 %v415_v18, %v415_v18 }
 0x1c3   :  { %v750_v17 = vsel %vm748_vm8, %v2229_v12, 0 }
 0x1c4   :  { %468 = vrot.lane.b32.xlu2 %v2214_v2, %s2061_s4  ;;  %1542 = vmatmul.msk.bf16.vlgmr.msrb.gmra.mxu0 %vm447_vm7, %v2214_v2  ;;  %v544_v16 = vsel %vm447_vm7, %v539_v13, 0 }
 0x1c5   :  { %553 = vmatpush.bf16.xpose.msrb.mxu1 %v544_v16 }
 0x1c6   :  { %v442_v36 = vpop.f32.mrf.mxu2 }
 0x1c7   :  { %v443_v57 = vadd.f32 %v442_v36, %v271_v4 }
 0x1c9   :  { %v2264_v60 = vpack.c.bf16 %v443_v57, %v443_v57 }
 0x1cb   :  { %v956_v63 = vsel %vm748_vm8, %v2264_v60, 0 }
 0x1cc   :  { %1546 = vmatmul.msk.bf16.vlgmr.msrb.gmra.mxu1 %vm447_vm7, %v538_v19  ;;  %563 = vrot.lane.b32.xlu2 %v539_v13, %s2061_s4 }
 0x1cd   :  { %759 = vmatpush.bf16.msra.mxu1 %v750_v17 }
 0x1d4   :  { %560 = vrot.lane.b32.xlu2 %v538_v19, %s2061_s4 }
 0x216   :  { %v472_v20 = vpop.permute.xlu2 %471 }
 0x217   :  { %v477_v21 = vsel %vm447_vm7, %v472_v20, 0 }
 0x218   :  { %486 = vmatpush.bf16.xpose.msra.mxu3 %v477_v21 }
 0x21e   :  { %v469_v22 = vpop.permute.xlu2 %468 }
 0x21f   :  { %1543 = vmatmul.msk.bf16.vlgmr.msra.gmra.mxu3 %vm447_vm7, %v469_v22 }
 0x226   :  { %v564_v23 = vpop.permute.xlu2 %563 }
 0x227   :  { %v569_v24 = vsel %vm447_vm7, %v564_v23, 0 }
 0x228   :  { %578 = vmatpush.bf16.xpose.msrb.mxu2 %v569_v24 }
 0x22e   :  { %v495_v25 = vpop.permute.xlu0 %494  ;;  %v561_v26 = vpop.permute.xlu2 %560 }
 0x22f   :  { %1547 = vmatmul.msk.bf16.vlgmr.msrb.gmra.mxu2 %vm447_vm7, %v561_v26  ;;  %v500_v27 = vsel %vm447_vm7, %v495_v25, 0  ;;  %v493_v28 = vpop.permute.xlu1 %492  ;;  %v2286_v26 = vld [vmem:[#allocation10 + $0x8] sm:$0xff] }
 0x230   :  { %509 = vmatpush.bf16.xpose.msrb.mxu3 %v500_v27 }
 0x237   :  { %1544 = vmatmul.msk.bf16.vlgmr.msrb.gmra.mxu3 %vm447_vm7, %v493_v28  ;;  %v2290_v28 = vld [vmem:[#allocation10] sm:$0xff] }
 0x241   :  { %v463_v29 = vpop.f32.mrf.mxu0 }
 0x242   :  { %v630_v30 = vmul.f32 0.17677669, %v463_v29 }
 0x244   :  { %v639_v31 = vsel %vm638_vm9, %v630_v30, -inf }
 0x245   :  { %640 = vmax.xlane.f32.xlu2 %v639_v31 }
 0x249   :  { %v465_v32 = vpop.f32.mrf.mxu0  ;;  %v2248_v33 = vpop.f32.mrf.mxu1 }
 0x24a   :  { %v634_v22 = vmul.f32 0.17677669, %v2248_v33 }
 0x24c   :  { %v651_v25 = vsel %vm638_vm9, %v634_v22, -inf }
 0x251   :  { %v557_v34 = vpop.f32.mrf.mxu1 }
 0x2a2   :  { %v488_v35 = vpop.f32.mrf.mxu3 }
 0x2a3   :  { %v631_v6 = vmul.f32 0.17677669, %v488_v35 }
 0x2a5   :  { %v642_v9 = vsel %vm638_vm9, %v631_v6, -inf }
 0x2aa   :  { %v490_v37 = vpop.f32.mrf.mxu3 }
 0x2b2   :  { %v580_v38 = vpop.f32.mrf.mxu2 }
 0x2b3   :  { %v635_v49 = vmul.f32 0.17677669, %v580_v38 }
 0x2b5   :  { %v654_v50 = vsel %vm638_vm9, %v635_v49, -inf }
 0x2b8   :  { %v641_v39 = vpop.xlane.xlu2 %640 }
 0x2b9   :  { %v663_v40 = vsub.f32 %v630_v30, %v641_v39 }
 0x2ba   :  { %v511_v41 = vpop.f32.mrf.mxu3  ;;  %v582_v42 = vpop.f32.mrf.mxu2 }
 0x2bb   :  { %v671_v43 = vmul.f32 1.442695, %v663_v40  ;;  %v632_v44 = vmul.f32 0.17677669, %v511_v41 }
 0x2bd   :  { %1782 = vpow2.f32 %v671_v43  ;;  %v645_v45 = vsel %vm638_vm9, %v632_v44, -inf }
 0x2be   :  { %646 = vmax.xlane.f32.xlu0 %v645_v45 }
 0x2c2   :  { %v513_v46 = vpop.f32.mrf.mxu3 }
 0x2c3   :  { %v1783_v47 = vpop.eup %1782 }
 0x2c4   :  { %v687_v48 = vsel %vm638_vm9, %v1783_v47, 0.0 }
 0x2c5   :  { %688 = vadd.xlane.f32.xlu1 %v687_v48 }
 0x2d2   :  { %847 = vrot.lane.b32.xlu0 %v2229_v12, %s2051_s20 }
 0x2da   :  { %586 = vrot.lane.b32.xlu0 %v539_v13, %s2051_s20 }
 0x2de   :  { %515 = vrot.lane.b32.xlu1 %v2214_v2, %s2062_s0 }
 0x2e2   :  { %584 = vrot.lane.b32.xlu0 %v538_v19, %s2051_s20 }
 0x2e6   :  { %609 = vrot.lane.b32.xlu1 %v539_v13, %s2062_s0 }
 0x2ea   :  { %607 = vrot.lane.b32.xlu0 %v538_v19, %s2062_s0 }
 0x310   :  { %655 = vmax.xlane.f32.xlu1 %v654_v50 }
 0x331   :  { %v647_v51 = vpop.xlane.xlu0 %646 }
 0x332   :  { %v665_v52 = vsub.f32 %v632_v44, %v647_v51 }
 0x334   :  { %v675_v53 = vmul.f32 1.442695, %v665_v52 }
 0x336   :  { %1784 = vpow2.f32 %v675_v53 }
 0x338   :  { %v689_v54 = vpop.xlane.xlu1 %688 }
 0x339   :  { %1786 = vrcp.f32 %v689_v54 }
 0x33c   :  { %v1785_v55 = vpop.eup %1784 }
 0x33d   :  { %v693_v56 = vsel %vm638_vm9, %v1785_v55, 0.0 }
 0x33e   :  { %694 = vadd.xlane.f32.xlu2 %v693_v56 }
 0x33f   :  { %v1787_v58 = vpop.eup %1786 }
 0x340   :  { %v719_v59 = vmul.f32 %v1787_v58, %v1783_v47  ;;  %v1723_v58 = vld [vmem:[#allocation10 + $0x28] sm:$0xff] }
 0x342   :  { %v743_v61 = vpack.c.bf16 %v719_v59, %v719_v59 }
 0x344   :  { %v848_v15 = vpop.permute.xlu0 %847  ;;  %1550 = vmatmul.msk.bf16.vlgmr.msra.gmra.mxu1 %vm638_vm9, %v743_v61  ;;  %v1722_v61 = vld [vmem:[#allocation10 + $0x20] sm:$0xff] }
 0x345   :  { %v853_v62 = vsel %vm748_vm8, %v848_v15, 0 }
 0x346   :  { %862 = vmatpush.bf16.msrb.mxu1 %v853_v62 }
 0x34a   :  { %965 = vmatpush.bf16.msra.mxu1 %v956_v63 }
 0x34c   :  { %v587_v2 = vpop.permute.xlu0 %586 }
 0x34d   :  { %v592_v11 = vsel %vm447_vm7, %v587_v2, 0 }
 0x34e   :  { %601 = vmatpush.bf16.xpose.msra.mxu3 %v592_v11 }
 0x350   :  { %v516_v5 = vpop.permute.xlu1 %515 }
 0x354   :  { %v585_v4 = vpop.permute.xlu0 %584 }
 0x355   :  { %1548 = vmatmul.msk.bf16.vlgmr.msra.gmra.mxu3 %vm447_vm7, %v585_v4 }
 0x356   :  { %517 = vrot.lane.b32.xlu2 %v2216_v3, %s2062_s0 }
 0x358   :  { %v610_v7 = vpop.permute.xlu1 %609 }
 0x359   :  { %v615_v23 = vsel %vm447_vm7, %v610_v7, 0 }
 0x35c   :  { %v608_v30 = vpop.permute.xlu0 %607 }
 0x37f   :  { %643 = vmax.xlane.f32.xlu2 %v642_v9 }
 0x383   :  { %v656_v10 = vpop.xlane.xlu1 %655 }
 0x384   :  { %v668_v13 = vsub.f32 %v635_v49, %v656_v10 }
 0x386   :  { %v681_v14 = vmul.f32 1.442695, %v668_v13 }
 0x388   :  { %1788 = vpow2.f32 %v681_v14 }
 0x38e   :  { %v2275_v16 = vpop.eup %1788 }
 0x38f   :  { %v702_v17 = vsel %vm638_vm9, %v2275_v16, 0.0 }
 0x390   :  { %703 = vadd.xlane.f32.xlu1 %v702_v17 }
 0x397   :  { %768 = vrot.lane.b32.xlu2 %v2229_v12, %s2061_s4 }
 0x3b1   :  { %v695_v3 = vpop.xlane.xlu2 %694 }
 0x3b2   :  { %1790 = vrcp.f32 %v695_v3  ;;  %v1721_v3 = vld [vmem:[#allocation10 + $0x18] sm:$0xff] }
 0x3b3   :  { %811 = vmatpush.bf16.msrb.mxu3 %v1721_v3 }
 0x3b8   :  { %v1791_v18 = vpop.eup %1790 }
 0x3b9   :  { %v721_v19 = vmul.f32 %v1791_v18, %v1785_v55  ;;  %v518_v20 = vpop.permute.xlu2 %517 }
 0x3ba   :  { %v523_v21 = vsel %vm447_vm7, %v518_v20, 0 }
 0x3bb   :  { %v846_v24 = vpack.c.bf16 %v721_v19, %v721_v19  ;;  %532 = vmatpush.bf16.xpose.msra.mxu0 %v523_v21 }
 0x3bd   :  { %1570 = vmatmul.msk.bf16.vlgmr.msrb.gmra.mxu1 %vm638_vm9, %v846_v24 }
 0x3c0   :  { %652 = vmax.xlane.f32.xlu2 %v651_v25 }
 0x3c1   :  { %v761_v27 = vpop.f32.mrf.mxu1 }
 0x3c2   :  { %1545 = vmatmul.msk.bf16.vlgmr.msra.gmra.mxu0 %vm447_vm7, %v516_v5  ;;  %v765_v32 = vpack.c.bf16 %v761_v27, %v761_v27 }
 0x3c3   :  { %624 = vmatpush.bf16.xpose.msrb.mxu0 %v615_v23  ;;  %v1720_v23 = vld [vmem:[#allocation10 + $0x10] sm:$0xff] }
 0x3c4   :  { %812 = vmatpush.bf16.msrb.mxu3 %v1720_v23 }
 0x3c9   :  { %v763_v29 = vpop.f32.mrf.mxu1 }
 0x3cb   :  { %839 = vmatpush.bf16.msra.mxu0 %v2286_v26 }
 0x3cf   :  { %840 = vmatpush.bf16.msra.mxu0 %v2290_v28 }
 0x3d2   :  { %1549 = vmatmul.msk.bf16.vlgmr.msrb.gmra.mxu0 %vm447_vm7, %v608_v30 }
 0x3d8   :  { %v603_v31 = vpop.f32.mrf.mxu3 }
 0x3d9   :  { %v636_v51 = vmul.f32 0.17677669, %v603_v31 }
 0x3db   :  { %v657_v53 = vsel %vm638_vm9, %v636_v51, -inf }
 0x3e0   :  { %v605_v33 = vpop.f32.mrf.mxu3 }
 0x3e2   :  { %1569 = vmatmul.msk.bf16.vlgmr.msra.gmra.mxu0 %vm447_vm7, %v765_v32 }
 0x3f2   :  { %v644_v34 = vpop.xlane.xlu2 %643 }
 0x3f3   :  { %v664_v35 = vsub.f32 %v631_v6, %v644_v34 }
 0x3f5   :  { %v673_v36 = vmul.f32 1.442695, %v664_v35 }
 0x3f7   :  { %1792 = vpow2.f32 %v673_v36 }
 0x3fa   :  { %v769_v37 = vpop.permute.xlu2 %768 }
 0x3fb   :  { %v774_v38 = vsel %vm748_vm8, %v769_v37, 0 }
 0x3fc   :  { %783 = vmatpush.bf16.msra.mxu2 %v774_v38 }
 0x3fd   :  { %v1793_v39 = vpop.eup %1792 }
 0x3fe   :  { %v690_v40 = vsel %vm638_vm9, %v1793_v39, 0.0 }
 0x3ff   :  { %691 = vadd.xlane.f32.xlu0 %v690_v40 }
 0x400   :  { %890 = vmatpush.bf16.msrb.mxu2 %v1723_v58 }
 0x403   :  { %v704_v6 = vpop.xlane.xlu1 %703 }
 0x404   :  { %891 = vmatpush.bf16.msrb.mxu2 %v1722_v61 }
 0x413   :  { %974 = vrot.lane.b32.xlu0 %v2264_v60, %s2061_s4 }
 0x433   :  { %v653_v41 = vpop.xlane.xlu2 %652 }
 0x434   :  { %v667_v42 = vsub.f32 %v634_v22, %v653_v41 }
 0x436   :  { %v679_v43 = vmul.f32 1.442695, %v667_v42 }
 0x438   :  { %1794 = vpow2.f32 %v679_v43 }
 0x43a   :  { %v864_v44 = vpop.f32.mrf.mxu1 }
 0x43b   :  { %v868_v7 = vpack.c.bf16 %v864_v44, %v864_v44 }
 0x43e   :  { %v1795_v45 = vpop.eup %1794 }
 0x43f   :  { %v534_v46 = vpop.f32.mrf.mxu0  ;;  %v699_v47 = vsel %vm638_vm9, %v1795_v45, 0.0 }
 0x440   :  { %v633_v48 = vmul.f32 0.17677669, %v534_v46  ;;  %700 = vadd.xlane.f32.xlu2 %v699_v47 }
 0x442   :  { %v866_v49 = vpop.f32.mrf.mxu1  ;;  %v648_v50 = vsel %vm638_vm9, %v633_v48, -inf }
 0x443   :  { %649 = vmax.xlane.f32.xlu1 %v648_v50 }
 0x447   :  { %v536_v52 = vpop.f32.mrf.mxu0 }
 0x44b   :  { %658 = vmax.xlane.f32.xlu1 %v657_v53 }
 0x44f   :  { %v626_v54 = vpop.f32.mrf.mxu0 }
 0x450   :  { %v637_v55 = vmul.f32 0.17677669, %v626_v54 }
 0x452   :  { %v660_v56 = vsel %vm638_vm9, %v637_v55, -inf }
 0x453   :  { %661 = vmax.xlane.f32.xlu1 %v660_v56 }
 0x457   :  { %v628_v57 = vpop.f32.mrf.mxu0 }
 0x45f   :  { %v2303_v59 = vpop.f32.mrf.mxu0 }
 0x467   :  { %v844_v15 = vpop.f32.mrf.mxu0 }
 0x46c   :  { %899 = vrot.lane.b32.xlu1 %v2229_v12, %s2062_s0 }
 0x472   :  { %v692_v62 = vpop.xlane.xlu0 %691 }
 0x473   :  { %1796 = vrcp.f32 %v692_v62 }
 0x474   :  { %1798 = vrcp.f32 %v704_v6 }
 0x479   :  { %v1797_v63 = vpop.eup %1796 }
 0x47a   :  { %v720_v2 = vmul.f32 %v1797_v63, %v1793_v39  ;;  %v1799_v9 = vpop.eup %1798 }
 0x47b   :  { %v724_v12 = vmul.f32 %v1799_v9, %v2275_v16 }
 0x47c   :  { %v766_v11 = vpack.c.bf16 %v720_v2, %v720_v2  ;;  %v1725_v2 = vld [vmem:[#allocation10 + $0x38] sm:$0xff] }
 0x47d   :  { %v972_v10 = vpack.c.bf16 %v724_v12, %v724_v12  ;;  %942 = vmatpush.bf16.msrb.mxu0 %v1725_v2 }
 0x47e   :  { %1551 = vmatmul.msk.bf16.vlgmr.msra.gmra.mxu2 %vm638_vm9, %v766_v11 }
 0x485   :  { %v975_v4 = vpop.permute.xlu0 %974 }
 0x486   :  { %v980_v5 = vsel %vm748_vm8, %v975_v4, 0 }
 0x487   :  { %989 = vmatpush.bf16.msra.mxu2 %v980_v5  ;;  %v1724_v5 = vld [vmem:[#allocation10 + $0x30] sm:$0xff] }
 0x488   :  { %943 = vmatpush.bf16.msrb.mxu0 %v1724_v5 }
 0x48c   :  { %1021 = vmatpush.bf16.msra.mxu0 %v2286_v26 }
 0x48e   :  { %1579 = vmatmul.msk.bf16.vlgmr.msrb.gmra.mxu2 %vm447_vm7, %v868_v7 }
 0x48f   :  { %1060 = vmatpush.bf16.msrb.mxu2 %v1723_v58 }
 0x490   :  { %1022 = vmatpush.bf16.msra.mxu0 %v2290_v28 }
 0x493   :  { %1061 = vmatpush.bf16.msrb.mxu2 %v1722_v61 }
 0x49e   :  { %1591 = vmatmul.msk.bf16.vlgmr.msra.gmra.mxu2 %vm638_vm9, %v972_v10 }
 0x4b3   :  { %v701_v13 = vpop.xlane.xlu2 %700 }
 0x4b4   :  { %1800 = vrcp.f32 %v701_v13 }
 0x4b6   :  { %v650_v14 = vpop.xlane.xlu1 %649 }
 0x4b7   :  { %v666_v17 = vsub.f32 %v633_v48, %v650_v14 }
 0x4b9   :  { %v677_v18 = vmul.f32 1.442695, %v666_v17 }
 0x4ba   :  { %v1801_v19 = vpop.eup %1800 }
 0x4bb   :  { %v723_v20 = vmul.f32 %v1801_v19, %v1795_v45  ;;  %1802 = vpow2.f32 %v677_v18 }
 0x4bd   :  { %v950_v21 = vpack.c.bf16 %v723_v20, %v723_v20 }
 0x4be   :  { %v659_v22 = vpop.xlane.xlu1 %658 }
 0x4bf   :  { %v669_v24 = vsub.f32 %v636_v51, %v659_v22  ;;  %1590 = vmatmul.msk.bf16.vlgmr.msra.gmra.mxu1 %vm638_vm9, %v950_v21  ;;  %v1770_v21 = vld [vmem:[%s2381_s6] ss:$0 sm:$0xff] }
 0x4c1   :  { %v1803_v16 = vpop.eup %1802  ;;  %v683_v25 = vmul.f32 1.442695, %v669_v24 }
 0x4c2   :  { %v696_v27 = vsel %vm638_vm9, %v1803_v16, 0.0 }
 0x4c3   :  { %1804 = vpow2.f32 %v683_v25  ;;  %697 = vadd.xlane.f32.xlu0 %v696_v27 }
 0x4c6   :  { %v662_v29 = vpop.xlane.xlu1 %661 }
 0x4c7   :  { %v670_v30 = vsub.f32 %v637_v55, %v662_v29 }
 0x4c9   :  { %v1805_v31 = vpop.eup %1804  ;;  %v685_v32 = vmul.f32 1.442695, %v670_v30 }
 0x4ca   :  { %v705_v33 = vsel %vm638_vm9, %v1805_v31, 0.0 }
 0x4cb   :  { %1806 = vpow2.f32 %v685_v32  ;;  %706 = vadd.xlane.f32.xlu1 %v705_v33 }
 0x4d1   :  { %v1807_v34 = vpop.eup %1806 }
 0x4d2   :  { %v708_v35 = vsel %vm638_vm9, %v1807_v34, 0.0 }
 0x4d3   :  { %709 = vadd.xlane.f32.xlu2 %v708_v35 }
 0x4d7   :  { %1029 = vrot.lane.b32.xlu0 %v2264_v60, %s2051_s20 }
 0x4de   :  { %v900_v36 = vpop.permute.xlu1 %899 }
 0x4df   :  { %v905_v37 = vsel %vm748_vm8, %v900_v36, 0 }
 0x4e0   :  { %914 = vmatpush.bf16.msra.mxu3 %v905_v37 }
 0x4eb   :  { %1069 = vrot.lane.b32.xlu2 %v2264_v60, %s2062_s0 }
 0x501   :  { %v785_v38 = vpop.f32.mrf.mxu2 }
 0x502   :  { %v789_v39 = vpack.c.bf16 %v785_v38, %v785_v38 }
 0x504   :  { %1560 = vmatmul.msk.bf16.vlgmr.msrb.gmra.mxu3 %vm447_vm7, %v789_v39 }
 0x505   :  { %1005 = vmatpush.bf16.msrb.mxu3 %v1721_v3 }
 0x509   :  { %v787_v40 = vpop.f32.mrf.mxu2  ;;  %1006 = vmatpush.bf16.msrb.mxu3 %v1720_v23 }
 0x511   :  { %v893_v41 = vpop.f32.mrf.mxu2 }
 0x519   :  { %v895_v42 = vpop.f32.mrf.mxu2 }
 0x521   :  { %v991_v43 = vpop.f32.mrf.mxu2 }
 0x522   :  { %v995_v61 = vpack.c.bf16 %v991_v43, %v991_v43 }
 0x529   :  { %v993_v44 = vpop.f32.mrf.mxu2 }
 0x536   :  { %v698_v45 = vpop.xlane.xlu0 %697 }
 0x537   :  { %1808 = vrcp.f32 %v698_v45  ;;  %v1733_v45 = vld [vmem:[#allocation11 + $0x38] sm:$0xff] }
 0x53c   :  { %v967_v46 = vpop.f32.mrf.mxu1 }
 0x53d   :  { %v1809_v47 = vpop.eup %1808  ;;  %v971_v17 = vpack.c.bf16 %v967_v46, %v967_v46  ;;  %v1731_v46 = vld [vmem:[#allocation11 + $0x28] sm:$0xff] }
 0x53e   :  { %v722_v48 = vmul.f32 %v1809_v47, %v1803_v16  ;;  %v707_v49 = vpop.xlane.xlu1 %706 }
 0x53f   :  { %1810 = vrcp.f32 %v707_v49  ;;  %v1730_v49 = vld [vmem:[#allocation11 + $0x20] sm:$0xff] }
 0x540   :  { %v898_v50 = vpack.c.bf16 %v722_v48, %v722_v48 }
 0x542   :  { %1580 = vmatmul.msk.bf16.vlgmr.msra.gmra.mxu3 %vm638_vm9, %v898_v50 }
 0x544   :  { %v969_v60 = vpop.f32.mrf.mxu1 }
 0x545   :  { %v1811_v51 = vpop.eup %1810  ;;  %v1729_v60 = vld [vmem:[#allocation11 + $0x18] sm:$0xff] }
 0x546   :  { %v710_v52 = vpop.xlane.xlu2 %709  ;;  %v725_v53 = vmul.f32 %v1811_v51, %v1805_v31  ;;  %v1728_v51 = vld [vmem:[#allocation11 + $0x10] sm:$0xff] }
 0x547   :  { %1812 = vrcp.f32 %v710_v52  ;;  %v1727_v52 = vld [vmem:[#allocation11 + $0x8] sm:$0xff] }
 0x548   :  { %v1028_v56 = vpack.c.bf16 %v725_v53, %v725_v53 }
 0x549   :  { %v1030_v54 = vpop.permute.xlu0 %1029 }
 0x54a   :  { %v1035_v55 = vsel %vm748_vm8, %v1030_v54, 0  ;;  %v1726_v54 = vld [vmem:[#allocation11] sm:$0xff] }
 0x54b   :  { %1044 = vmatpush.bf16.msrb.mxu1 %v1035_v55 }
 0x54d   :  { %v1813_v15 = vpop.eup %1812 }
 0x54e   :  { %v1070_v57 = vpop.permute.xlu2 %1069  ;;  %1594 = vmatmul.msk.bf16.vlgmr.msrb.gmra.mxu1 %vm638_vm9, %v1028_v56  ;;  %v726_v62 = vmul.f32 %v1813_v15, %v1807_v34  ;;  %v1741_v56 = vld [vmem:[#allocation13 + $0x38] sm:$0xff]  ;;  %v1740_v15 = vld [vmem:[#allocation13 + $0x30] sm:$0xff] }
 0x54f   :  { %v1075_v58 = vsel %vm748_vm8, %v1070_v57, 0  ;;  %1237 = vmatpush.bf16.msra.mxu1 %v1733_v45  ;;  %1322 = vmatpush.bf16.msra.mxu2 %v1741_v56  ;;  %v1774_v45 = vld [vmem:[%s2387_s12] ss:$0 sm:$0xff] }
 0x550   :  { %1084 = vmatpush.bf16.msra.mxu3 %v1075_v58  ;;  %v1068_v63 = vpack.c.bf16 %v726_v62, %v726_v62 }
 0x552   :  { %1592 = vmatmul.msk.bf16.vlgmr.msrb.gmra.mxu3 %vm447_vm7, %v995_v61 }
 0x553   :  { %1323 = vmatpush.bf16.msra.mxu2 %v1740_v15 }
 0x562   :  { %1596 = vmatmul.msk.bf16.vlgmr.msra.gmra.mxu3 %vm638_vm9, %v1068_v63 }
 0x587   :  { %v814_v11 = vpop.f32.mrf.mxu3 }
 0x588   :  { %v843_v19 = vadd.f32 %v2303_v59, %v814_v11 }
 0x58a   :  { %v897_v20 = vadd.f32 %v893_v41, %v843_v19 }
 0x58f   :  { %v816_v4 = vpop.f32.mrf.mxu3 }
 0x590   :  { %v1738_v4 = vld [vmem:[#allocation13 + $0x20] sm:$0xff] }
 0x5c5   :  { %v916_v6 = vpop.f32.mrf.mxu3 }
 0x5c6   :  { %v920_v7 = vpack.c.bf16 %v916_v6, %v916_v6 }
 0x5c8   :  { %1589 = vmatmul.msk.bf16.vlgmr.msrb.gmra.mxu0 %vm447_vm7, %v920_v7 }
 0x5c9   :  { %1100 = vmatpush.bf16.msrb.mxu0 %v1725_v2  ;;  %v1739_v2 = vld [vmem:[#allocation13 + $0x28] sm:$0xff] }
 0x5ca   :  { %1324 = vmatpush.bf16.msra.mxu2 %v1739_v2 }
 0x5cb   :  { %v1046_v9 = vpop.f32.mrf.mxu1 }
 0x5cc   :  { %v1050_v12 = vpack.c.bf16 %v1046_v9, %v1046_v9 }
 0x5cd   :  { %v918_v10 = vpop.f32.mrf.mxu3  ;;  %1101 = vmatpush.bf16.msrb.mxu0 %v1724_v5 }
 0x5ce   :  { %1595 = vmatmul.msk.bf16.vlgmr.msrb.gmra.mxu2 %vm447_vm7, %v1050_v12 }
 0x5cf   :  { %1325 = vmatpush.bf16.msra.mxu2 %v1738_v4 }
 0x5d3   :  { %v1048_v13 = vpop.f32.mrf.mxu1 }
 0x5d5   :  { %v1008_v14 = vpop.f32.mrf.mxu3 }
 0x5d8   :  { %1593 = vmatmul.msk.bf16.vlgmr.msra.gmra.mxu0 %vm447_vm7, %v971_v17 }
 0x5dd   :  { %v1010_v3 = vpop.f32.mrf.mxu3 }
 0x5e5   :  { %v1086_v26 = vpop.f32.mrf.mxu3 }
 0x5e6   :  { %v1090_v18 = vpack.c.bf16 %v1086_v26, %v1086_v26 }
 0x5e8   :  { %1597 = vmatmul.msk.bf16.vlgmr.msrb.gmra.mxu0 %vm447_vm7, %v1090_v18 }
 0x5ed   :  { %v1088_v28 = vpop.f32.mrf.mxu3 }
 0x5ee   :  { %v1772_v28 = vld [vmem:[%s2383_s8] ss:$0 sm:$0xff] }
 0x645   :  { %v945_v22 = vpop.f32.mrf.mxu0 }
 0x646   :  { %v949_v23 = vadd.f32 %v945_v22, %v897_v20 }
 0x648   :  { %v1112_v24 = vadd.f32 %v1770_v21, %v949_v23  ;;  %v1737_v23 = vld [vmem:[#allocation13 + $0x18] sm:$0xff] }
 0x649   :  { %1326 = vmatpush.bf16.msra.mxu2 %v1737_v23 }
 0x64a   :  { %v2339_v16 = vadd.f32 %v1112_v24, %v2183_v0  ;;  %v1736_v24 = vld [vmem:[#allocation13 + $0x10] sm:$0xff] }
 0x64c   :  { %1118 = vadd.xlane.f32.xlu0 %v2339_v16 }
 0x64d   :  { %v947_v25 = vpop.f32.mrf.mxu0  ;;  %1327 = vmatpush.bf16.msra.mxu2 %v1736_v24 }
 0x64e   :  { %v1735_v25 = vld [vmem:[#allocation13 + $0x8] sm:$0xff] }
 0x651   :  { %v1063_v27 = vpop.f32.mrf.mxu2  ;;  %1328 = vmatpush.bf16.msra.mxu2 %v1735_v25 }
 0x655   :  { %v1024_v29 = vpop.f32.mrf.mxu0 }
 0x656   :  { %v1025_v32 = vadd.f32 %v1024_v29, %v1008_v14  ;;  %v1771_v14 = vld [vmem:[%s2382_s7] ss:$0 sm:$0xff]  ;;  %v1749_v29 = vld [vmem:[#allocation14 + $0x38] sm:$0xff] }
 0x657   :  { %1407 = vmatpush.bf16.msrb.mxu3 %v1749_v29 }
 0x658   :  { %v1067_v59 = vadd.f32 %v1063_v27, %v1025_v32  ;;  %v1734_v27 = vld [vmem:[#allocation13] sm:$0xff] }
 0x659   :  { %v1065_v30 = vpop.f32.mrf.mxu2  ;;  %1329 = vmatpush.bf16.msra.mxu2 %v1734_v27  ;;  %v1746_v32 = vld [vmem:[#allocation14 + $0x20] sm:$0xff] }
 0x65a   :  { %v1748_v30 = vld [vmem:[#allocation14 + $0x30] sm:$0xff] }
 0x65b   :  { %1408 = vmatpush.bf16.msrb.mxu3 %v1748_v30 }
 0x65d   :  { %v1026_v31 = vpop.f32.mrf.mxu0 }
 0x65e   :  { %v1747_v31 = vld [vmem:[#allocation14 + $0x28] sm:$0xff] }
 0x65f   :  { %1409 = vmatpush.bf16.msrb.mxu3 %v1747_v31 }
 0x663   :  { %1410 = vmatpush.bf16.msrb.mxu3 %v1746_v32 }
 0x665   :  { %v1103_v33 = vpop.f32.mrf.mxu0 }
 0x666   :  { %v1107_v34 = vadd.f32 %v1103_v33, %v1067_v59  ;;  %v1773_v33 = vld [vmem:[%s2385_s10] ss:$0 sm:$0xff] }
 0x668   :  { %v1113_v35 = vadd.f32 %v1770_v21, %v1107_v34 }
 0x66a   :  { %v2343_v36 = vadd.f32 %v1113_v35, %v2186_v1  ;;  %v1732_v1 = vld [vmem:[#allocation11 + $0x30] sm:$0xff] }
 0x66b   :  { %1238 = vmatpush.bf16.msra.mxu1 %v1732_v1 }
 0x66c   :  { %1120 = vadd.xlane.f32.xlu2 %v2343_v36 }
 0x66d   :  { %v1105_v37 = vpop.f32.mrf.mxu0 }
 0x66f   :  { %1239 = vmatpush.bf16.msra.mxu1 %v1731_v46 }
 0x673   :  { %1240 = vmatpush.bf16.msra.mxu1 %v1730_v49 }
 0x677   :  { %1241 = vmatpush.bf16.msra.mxu1 %v1729_v60  ;;  %v1775_v60 = vld [vmem:[%s2389_s14] ss:$0 sm:$0xff] }
 0x67b   :  { %1242 = vmatpush.bf16.msra.mxu1 %v1728_v51 }
 0x67f   :  { %1243 = vmatpush.bf16.msra.mxu1 %v1727_v52 }
 0x683   :  { %1244 = vmatpush.bf16.msra.mxu1 %v1726_v54 }
 0x6bf   :  { %v1119_v0 = vpop.xlane.xlu0 %1118 }
 0x6c0   :  { %v1122_v38 = vmul.f32 %v1119_v0, %v2189_v8 }
 0x6c2   :  { %v1124_v39 = vsub.f32 %v2339_v16, %v1122_v38 }
 0x6c4   :  { %v1126_v40 = vmul.f32 %v1124_v39, %v1124_v39 }
 0x6c6   :  { %1128 = vadd.xlane.f32.xlu1 %v1126_v40  ;;  %v1745_v40 = vld [vmem:[#allocation14 + $0x18] sm:$0xff] }
 0x6c7   :  { %1411 = vmatpush.bf16.msrb.mxu3 %v1745_v40 }
 0x6df   :  { %v1121_v41 = vpop.xlane.xlu2 %1120 }
 0x6e0   :  { %v1123_v42 = vmul.f32 %v1121_v41, %v2189_v8  ;;  %v1744_v41 = vld [vmem:[#allocation14 + $0x10] sm:$0xff] }
 0x6e1   :  { %1412 = vmatpush.bf16.msrb.mxu3 %v1744_v41 }
 0x6e2   :  { %v1125_v43 = vsub.f32 %v2343_v36, %v1123_v42  ;;  %v1743_v42 = vld [vmem:[#allocation14 + $0x8] sm:$0xff] }
 0x6e4   :  { %v1127_v44 = vmul.f32 %v1125_v43, %v1125_v43 }
 0x6e5   :  { %1413 = vmatpush.bf16.msrb.mxu3 %v1743_v42 }
 0x6e6   :  { %1130 = vadd.xlane.f32.xlu1 %v1127_v44 }
 0x739   :  { %v1129_v47 = vpop.xlane.xlu1 %1128 }
 0x73a   :  { %v1132_v48 = vmul.f32 %v1129_v47, %v2189_v8 }
 0x73c   :  { %v1134_v50 = vadd.f32 1e-05, %v1132_v48 }
 0x73e   :  { %1814 = vrsqrt.f32 %v1134_v50  ;;  %vm1142_vm11 = vweird.f32 %v1134_v50 }
 0x744   :  { %v1815_v53 = vpop.eup %1814 }
 0x745   :  { %v1137_v55 = vmul.f32 %v1815_v53, %v1134_v50  ;;  %vm1143_vm10 = vweird.f32 %v1815_v53 }
 0x746   :  { %vm1144_vm12 = vmor %vm1142_vm11, %vm1143_vm10 }
 0x747   :  { %v1138_v57 = vmul.f32 %v1815_v53, %v1137_v55 }
 0x749   :  { %v1139_v63 = vmul.f32 0.5, %v1138_v57 }
 0x74b   :  { %v1140_v11 = vsub.f32 1.5, %v1139_v63 }
 0x74d   :  { %v1141_v6 = vmul.f32 %v1815_v53, %v1140_v11 }
 0x74f   :  { %v1145_v12 = vsel %vm1144_vm12, %v1815_v53, %v1141_v6 }
 0x750   :  { %v1156_v13 = vmul.f32 %v1145_v12, %v1124_v39 }
 0x752   :  { %v1161_v18 = vmul.f32 %v1771_v14, %v1156_v13 }
 0x754   :  { %v1166_v20 = vadd.f32 %v1772_v28, %v1161_v18 }
 0x759   :  { %v1131_v58 = vpop.xlane.xlu1 %1130 }
 0x75a   :  { %v1133_v61 = vmul.f32 %v1131_v58, %v2189_v8 }
 0x75c   :  { %v1135_v62 = vadd.f32 1e-05, %v1133_v61 }
 0x75e   :  { %1816 = vrsqrt.f32 %v1135_v62  ;;  %vm1152_vm14 = vweird.f32 %v1135_v62 }
 0x764   :  { %v1817_v5 = vpop.eup %1816 }
 0x765   :  { %v1147_v7 = vmul.f32 %v1817_v5, %v1135_v62  ;;  %vm1153_vm13 = vweird.f32 %v1817_v5 }
 0x766   :  { %vm1154_vm15 = vmor %vm1152_vm14, %vm1153_vm13 }
 0x767   :  { %v1148_v9 = vmul.f32 %v1817_v5, %v1147_v7 }
 0x769   :  { %v1149_v8 = vmul.f32 0.5, %v1148_v9 }
 0x76b   :  { %v1150_v10 = vsub.f32 1.5, %v1149_v8 }
 0x76d   :  { %v1151_v17 = vmul.f32 %v1817_v5, %v1150_v10 }
 0x76f   :  { %v1155_v3 = vsel %vm1154_vm15, %v1817_v5, %v1151_v17 }
 0x770   :  { %v1157_v26 = vmul.f32 %v1155_v3, %v1125_v43  ;;  %v1742_v43 = vld [vmem:[#allocation14] sm:$0xff] }
 0x771   :  { %1414 = vmatpush.bf16.msrb.mxu3 %v1742_v43 }
 0x772   :  { %v1162_v19 = vmul.f32 %v1771_v14, %v1157_v26 }
 0x774   :  { %v1167_v21 = vadd.f32 %v1772_v28, %v1162_v19 }
 0x776   :  { %v1168_v22 = vpack.c.bf16 %v1167_v21, %v1166_v20 }
 0x778   :  { %1245 = vmatmul.bf16.vlgmr.msra.gmra.mxu1 %v1168_v22 }
 0x7f5   :  { %v1246_v59 = vpop.f32.mrf.mxu1 }
 0x7f6   :  { %v1247_v34 = vadd.f32 %v1773_v33, %v1246_v59 }
 0x7f8   :  { %v1251_v0 = vmax.f32 %v1247_v34, 0.0 }
 0x7fd   :  { %v1248_v35 = vpop.f32.mrf.mxu1 }
 0x7fe   :  { %v1249_v37 = vadd.f32 %v1773_v33, %v1248_v35 }
 0x800   :  { %v1252_v38 = vmax.f32 %v1249_v37, 0.0 }
 0x802   :  { %v1253_v39 = vpack.c.bf16 %v1252_v38, %v1251_v0 }
 0x804   :  { %1330 = vmatmul.bf16.vlgmr.msra.gmra.mxu2 %v1253_v39 }
 0x887   :  { %v1331_v44 = vpop.f32.mrf.mxu2 }
 0x888   :  { %v1332_v1 = vadd.f32 %v1774_v45, %v1331_v44 }
 0x88a   :  { %v1336_v48 = vadd.f32 %v1332_v1, %v2339_v16 }
 0x88f   :  { %v1333_v46 = vpop.f32.mrf.mxu2 }
 0x890   :  { %v1334_v47 = vadd.f32 %v1774_v45, %v1333_v46 }
 0x892   :  { %v1337_v49 = vadd.f32 %v1334_v47, %v2343_v36 }
 0x894   :  { %v1338_v50 = vpack.c.bf16 %v1337_v49, %v1336_v48 }
 0x896   :  { %1415 = vmatmul.bf16.vlgmr.msrb.gmra.mxu3 %v1338_v50 }
 0x919   :  { %v1416_v51 = vpop.f32.mrf.mxu3 }
 0x91a   :  { %v1417_v52 = vadd.f32 %v1775_v60, %v1416_v51 }
 0x91c   :  { %1421 = vst [vmem:[#allocation16] sm:$0xff] %v1417_v52 }
 0x921   :  { %v1418_v53 = vpop.f32.mrf.mxu3 }
 0x922   :  { %v1419_v54 = vadd.f32 %v1775_v60, %v1418_v53 }
 0x924   :  { %1422 = vst [vmem:[#allocation16 + $0x8] sm:$0xff] %v1419_v54 }
 0x925   :  { %1435 = dma.vmem_to_hbm [thread:$0]  %s1428_s21, 256, %s1430_s2, [#allocation4], %s2054_s25, %s2054_s25, %s2055_s9  }
 0x926   :  { %2044 = dma.done.wait [#allocation4], 256  }
 0x927   :  { %2045 = vsyncadd [#allocation4], 4294967040 }
 0x928   :  { %1440 = vsyncpa [#allocation3], 1 }
 0x929   :  { %1441 = vsyncpa [#allocation6], 1 }
 0x92a   :  { %1442 = vsyncpa [#allocation9], 1 }
 0x92b   :  { %1443 = vsyncpa [#allocation12], 1 }
 0x92c   :  { %1444 = vsyncpa [#allocation15], 1 }
 0x92d   :  { %1445 = vsyncpa [#allocation4], 1 }

</bundles_post_ra>
